<compile_context>
chip_gen: v7x
topology: tpu7x:2x2x1
jax: 0.10.0
libtpu: 0.0.40
codegen_flags: <defaults>
</compile_context>

<pallas_src>
import functools
import math

import jax
import jax.numpy as jnp
from jax.experimental import pallas as pl
from jax.experimental.pallas import tpu as pltpu

# ---------------- tiny synthetic BERT config ----------------
VOCAB = 64
HIDDEN = 64
LAYERS = 2
HEADS = 4
HEAD_DIM = HIDDEN // HEADS
INTERMEDIATE = 128
MAX_LEN = 16
EPS = 1e-12  # BERT LayerNorm eps


# ---------------- fused forward kernel ----------------
def _layernorm(y, g, b):
    mu = jnp.mean(y, axis=-1, keepdims=True)
    d = y - mu
    var = jnp.mean(d * d, axis=-1, keepdims=True)
    return d * jax.lax.rsqrt(var + EPS) * g + b


def _gelu(x):
    # TODO(synk): HF BERT default is exact (erf) GELU; tanh approximation used here.
    return 0.5 * x * (1.0 + jnp.tanh(0.7978845608028654 * (x + 0.044715 * x * x * x)))


def _fused_bert_kernel(pos1_ref, pos2_ref,                      # scalar prefetch (SMEM)
                       x_ref, mask_ref,
                       emb_g_ref, emb_b_ref,
                       wqkv_ref, bqkv_ref, wo_ref, bo_ref,
                       ln1g_ref, ln1b_ref,
                       w1_ref, b1_ref, w2_ref, b2_ref,
                       ln2g_ref, ln2b_ref,
                       pw_ref, pb_ref,
                       out_ref,
                       h_sc,                                    # VMEM scratch [S, H] f32
                       *, example):
    b = pl.program_id(0)
    S, H = x_ref.shape
    scale = 1.0 / math.sqrt(HEAD_DIM)

    # embedding LayerNorm (no residual add needed)
    h = _layernorm(x_ref[...], emb_g_ref[...], emb_b_ref[...])          # [S, H] f32

    mask_row = mask_ref[...]                                            # [1, S] f32
    mask_add = (1.0 - mask_row) * -10000.0

    for l in range(LAYERS):
        # ---- fused QKV projection (single N=3H matmul, bf16 -> f32 acc) ----
        hb = h.astype(jnp.bfloat16)
        qkv = jnp.dot(hb, wqkv_ref[l],
                      preferred_element_type=jnp.float32) + bqkv_ref[l]  # [S, 3H]

        # ---- multi-head attention, heads as a static register-level loop ----
        ctx_heads = []
        for hh in range(HEADS):
            lo = hh * HEAD_DIM
            q_h = qkv[:, lo:lo + HEAD_DIM].astype(jnp.bfloat16)          # [S, Dh]
            k_h = qkv[:, H + lo:H + lo + HEAD_DIM].astype(jnp.bfloat16)
            v_h = qkv[:, 2 * H + lo:2 * H + lo + HEAD_DIM].astype(jnp.bfloat16)
            s = jax.lax.dot_general(
                q_h, k_h, dimension_numbers=(((1,), (1,)), ((), ())),
                preferred_element_type=jnp.float32) * scale              # [S, S]
            s = s + mask_add
            m = jnp.max(s, axis=-1, keepdims=True)
            p = jnp.exp(s - m)
            p = p / jnp.sum(p, axis=-1, keepdims=True)
            ctx_heads.append(jnp.dot(p.astype(jnp.bfloat16), v_h,
                                     preferred_element_type=jnp.float32))  # [S, Dh]
        ctx = jnp.concatenate(ctx_heads, axis=-1)                        # [S, H]

        attn_out = jnp.dot(ctx.astype(jnp.bfloat16), wo_ref[l],
                           preferred_element_type=jnp.float32) + bo_ref[l]
        h = _layernorm(attn_out + h, ln1g_ref[l], ln1b_ref[l])

        # ---- FFN ----
        ff = jnp.dot(h.astype(jnp.bfloat16), w1_ref[l],
                     preferred_element_type=jnp.float32) + b1_ref[l]
        ff = _gelu(ff)
        ff = jnp.dot(ff.astype(jnp.bfloat16), w2_ref[l],
                     preferred_element_type=jnp.float32) + b2_ref[l]
        h = _layernorm(ff + h, ln2g_ref[l], ln2b_ref[l])

    if example:
        # entity-marker gather: hidden[pos1], hidden[pos2] -> concat [1, 2H]
        h_sc[...] = h
        p1 = pos1_ref[b]
        p2 = pos2_ref[b]
        h_state = h_sc[pl.ds(p1, 1), :]                                  # [1, H]
        t_state = h_sc[pl.ds(p2, 1), :]                                  # [1, H]
        out_ref[...] = jnp.concatenate([h_state, t_state], axis=-1)
    else:
        # pooler_output = tanh(W_p * h[CLS] + b_p)
        cls = h[0:1, :]
        pooled = jnp.tanh(jnp.dot(cls.astype(jnp.bfloat16), pw_ref[...],
                                  preferred_element_type=jnp.float32) + pb_ref[...])
        # reference: hidden[:, 1:].sum(-2) / mask[:, 1:].sum(-1)  (unmasked numerator)
        row = jax.lax.broadcasted_iota(jnp.int32, (S, 1), 0)
        col = jax.lax.broadcasted_iota(jnp.int32, (1, S), 1)
        num = jnp.sum(jnp.where(row >= 1, h, 0.0), axis=0, keepdims=True)        # [1, H]
        den = jnp.sum(jnp.where(col >= 1, mask_row, 0.0), axis=-1, keepdims=True)  # [1, 1]
        out_ref[...] = jnp.concatenate([pooled, num / den], axis=-1)


# ---------------- wrapper ----------------
def bert_sentence_encoder(params, word, mask, pos1, pos2, example=True):
    """Forward of BERTSentenceEncoder.forward (inference semantics)."""
    B, S = word.shape
    H, L, I = HIDDEN, LAYERS, INTERMEDIATE

    # TODO(synk): embedding table lookups are XLA gathers; kept in plain JAX.
    # token_type ids are always the default zeros in the reference forward.
    x = (params["word_emb"][word]
         + params["pos_emb"][None, :S, :]
         + params["type_emb"][0][None, None, :])                 # [B, S, H] f32
    mask3 = mask.astype(jnp.float32).reshape(B, 1, S)

    def bmap(b, p1, p2): return (b, 0, 0)
    def rep2(b, p1, p2): return (0, 0)
    def rep3(b, p1, p2): return (0, 0, 0)

    in_specs = [
        pl.BlockSpec((None, S, H), bmap),         # x (per-batch block)
        pl.BlockSpec((None, 1, S), bmap),         # mask (per-batch block)
        pl.BlockSpec((1, H), rep2),               # emb_ln_g
        pl.BlockSpec((1, H), rep2),               # emb_ln_b
        pl.BlockSpec((L, H, 3 * H), rep3),        # wqkv (bf16, VMEM-resident)
        pl.BlockSpec((L, 1, 3 * H), rep3),        # bqkv
        pl.BlockSpec((L, H, H), rep3),            # wo
        pl.BlockSpec((L, 1, H), rep3),            # bo
        pl.BlockSpec((L, 1, H), rep3),            # ln1_g
        pl.BlockSpec((L, 1, H), rep3),            # ln1_b
        pl.BlockSpec((L, H, I), rep3),            # w1
        pl.BlockSpec((L, 1, I), rep3),            # b1
        pl.BlockSpec((L, I, H), rep3),            # w2
        pl.BlockSpec((L, 1, H), rep3),            # b2
        pl.BlockSpec((L, 1, H), rep3),            # ln2_g
        pl.BlockSpec((L, 1, H), rep3),            # ln2_b
        pl.BlockSpec((H, H), rep2),               # pooler_w
        pl.BlockSpec((1, H), rep2),               # pooler_b
    ]

    grid_spec = pltpu.PrefetchScalarGridSpec(
        num_scalar_prefetch=2,                    # pos1, pos2 land in SMEM
        grid=(B,),
        in_specs=in_specs,
        out_specs=pl.BlockSpec((None, 1, 2 * H), bmap),
        scratch_shapes=[pltpu.VMEM((S, H), jnp.float32)],
    )

    out = pl.pallas_call(
        functools.partial(_fused_bert_kernel, example=example),
        grid_spec=grid_spec,
        out_shape=jax.ShapeDtypeStruct((B, 1, 2 * H), jnp.float32),
        compiler_params=pltpu.CompilerParams(
            dimension_semantics=("parallel",)),   # batch axis shards across TCs on v7x
    )(pos1.astype(jnp.int32), pos2.astype(jnp.int32),
      x, mask3,
      params["emb_ln_g"], params["emb_ln_b"],
      params["wqkv"], params["bqkv"], params["wo"], params["bo"],
      params["ln1_g"], params["ln1_b"],
      params["w1"], params["b1"], params["w2"], params["b2"],
      params["ln2_g"], params["ln2_b"],
      params["pooler_w"], params["pooler_b"])
    # TODO(synk): nn.Dropout is identity at inference; train-mode dropout not implemented.
    return out.reshape(B, 2 * H)


# ---------------- deterministic packed parameter init ----------------
def init_params(key):
    ks = iter(jax.random.split(key, 10))

    def nrm(shape):
        return jax.random.normal(next(ks), shape, jnp.float32) * 0.02

    wq = nrm((LAYERS, HIDDEN, HIDDEN))
    wk = nrm((LAYERS, HIDDEN, HIDDEN))
    wv = nrm((LAYERS, HIDDEN, HIDDEN))

    params = {
        "word_emb": nrm((VOCAB, HIDDEN)),
        "pos_emb": nrm((MAX_LEN, HIDDEN)),
        "type_emb": nrm((2, HIDDEN)),
        "emb_ln_g": jnp.ones((1, HIDDEN), jnp.float32),
        "emb_ln_b": jnp.zeros((1, HIDDEN), jnp.float32),
        # packed / stacked per-layer weights; matmul weights pre-cast to bf16
        "wqkv": jnp.concatenate([wq, wk, wv], axis=-1).astype(jnp.bfloat16),   # [L, H, 3H]
        "bqkv": jnp.zeros((LAYERS, 1, 3 * HIDDEN), jnp.float32),
        "wo": nrm((LAYERS, HIDDEN, HIDDEN)).astype(jnp.bfloat16),
        "bo": jnp.zeros((LAYERS, 1, HIDDEN), jnp.float32),
        "ln1_g": jnp.ones((LAYERS, 1, HIDDEN), jnp.float32),
        "ln1_b": jnp.zeros((LAYERS, 1, HIDDEN), jnp.float32),
        "w1": nrm((LAYERS, HIDDEN, INTERMEDIATE)).astype(jnp.bfloat16),
        "b1": jnp.zeros((LAYERS, 1, INTERMEDIATE), jnp.float32),
        "w2": nrm((LAYERS, INTERMEDIATE, HIDDEN)).astype(jnp.bfloat16),
        "b2": jnp.zeros((LAYERS, 1, HIDDEN), jnp.float32),
        "ln2_g": jnp.ones((LAYERS, 1, HIDDEN), jnp.float32),
        "ln2_b": jnp.zeros((LAYERS, 1, HIDDEN), jnp.float32),
        "pooler_w": nrm((HIDDEN, HIDDEN)).astype(jnp.bfloat16),
        "pooler_b": jnp.zeros((1, HIDDEN), jnp.float32),
    }
    return params


if __name__ == "__main__":
    key = jax.random.PRNGKey(0)
    pkey, dkey = jax.random.split(key)
    params = init_params(pkey)

    B, S = 2, MAX_LEN
    word = jax.random.randint(dkey, (B, S), 0, VOCAB, dtype=jnp.int32)
    mask = jnp.ones((B, S), jnp.int32).at[:, 12:].set(0)   # last tokens padded
    pos1 = jnp.array([1, 3], jnp.int32)
    pos2 = jnp.array([5, 7], jnp.int32)

    # example=True path: concat of entity-marker hidden states -> [B, 2H]
    state = bert_sentence_encoder(params, word, mask, pos1, pos2, example=True)
    jax.block_until_ready(state)
    assert state.shape == (B, 2 * HIDDEN)

    # example=False path: concat(pooler_output, mean of tokens 1:) -> [B, 2H]
    pooled = bert_sentence_encoder(params, word, mask, pos1, pos2, example=False)
    jax.block_until_ready(pooled)
    assert pooled.shape == (B, 2 * HIDDEN)

    print("KERNEL_OK")
</pallas_src>

<mosaic_0001>
module attributes {stable_mosaic.version = 11 : i64} {
  func.func @_fused_bert_kernel(%arg0: i32, %arg1: memref<2xi32, #tpu.memory_space<smem>>, %arg2: memref<2xi32, #tpu.memory_space<smem>>, %arg3: memref<1x16x64xf32, #tpu.memory_space<vmem>>, %arg4: memref<1x1x16xf32, #tpu.memory_space<vmem>>, %arg5: memref<1x64xf32, #tpu.memory_space<vmem>>, %arg6: memref<1x64xf32, #tpu.memory_space<vmem>>, %arg7: memref<2x64x192xbf16, #tpu.memory_space<vmem>>, %arg8: memref<2x1x192xf32, #tpu.memory_space<vmem>>, %arg9: memref<2x64x64xbf16, #tpu.memory_space<vmem>>, %arg10: memref<2x1x64xf32, #tpu.memory_space<vmem>>, %arg11: memref<2x1x64xf32, #tpu.memory_space<vmem>>, %arg12: memref<2x1x64xf32, #tpu.memory_space<vmem>>, %arg13: memref<2x64x128xbf16, #tpu.memory_space<vmem>>, %arg14: memref<2x1x128xf32, #tpu.memory_space<vmem>>, %arg15: memref<2x128x64xbf16, #tpu.memory_space<vmem>>, %arg16: memref<2x1x64xf32, #tpu.memory_space<vmem>>, %arg17: memref<2x1x64xf32, #tpu.memory_space<vmem>>, %arg18: memref<2x1x64xf32, #tpu.memory_space<vmem>>, %arg19: memref<64x64xbf16, #tpu.memory_space<vmem>>, %arg20: memref<1x64xf32, #tpu.memory_space<vmem>>, %arg21: memref<1x1x128xf32, #tpu.memory_space<vmem>>, %arg22: memref<16x64xf32, #tpu.memory_space<vmem>>) attributes {dimension_semantics = [#tpu.dimension_semantics<parallel>], iteration_bounds = array<i64: 2>, scalar_prefetch = 2 : i64, scratch_operands = 1 : i64, tpu.core_type = #tpu.core_type<tc>, window_params = [{transform_indices = @transform_0, window_bounds = array<i64: 1, 16, 64>}, {transform_indices = @transform_1, window_bounds = array<i64: 1, 1, 16>}, {pipeline_mode = #tpu.pipeline_mode<synchronous>, transform_indices = @transform_2, window_bounds = array<i64: 1, 64>}, {pipeline_mode = #tpu.pipeline_mode<synchronous>, transform_indices = @transform_3, window_bounds = array<i64: 1, 64>}, {pipeline_mode = #tpu.pipeline_mode<synchronous>, transform_indices = @transform_4, window_bounds = array<i64: 2, 64, 192>}, {pipeline_mode = #tpu.pipeline_mode<synchronous>, transform_indices = @transform_5, window_bounds = array<i64: 2, 1, 192>}, {pipeline_mode = #tpu.pipeline_mode<synchronous>, transform_indices = @transform_6, window_bounds = array<i64: 2, 64, 64>}, {pipeline_mode = #tpu.pipeline_mode<synchronous>, transform_indices = @transform_7, window_bounds = array<i64: 2, 1, 64>}, {pipeline_mode = #tpu.pipeline_mode<synchronous>, transform_indices = @transform_8, window_bounds = array<i64: 2, 1, 64>}, {pipeline_mode = #tpu.pipeline_mode<synchronous>, transform_indices = @transform_9, window_bounds = array<i64: 2, 1, 64>}, {pipeline_mode = #tpu.pipeline_mode<synchronous>, transform_indices = @transform_10, window_bounds = array<i64: 2, 64, 128>}, {pipeline_mode = #tpu.pipeline_mode<synchronous>, transform_indices = @transform_11, window_bounds = array<i64: 2, 1, 128>}, {pipeline_mode = #tpu.pipeline_mode<synchronous>, transform_indices = @transform_12, window_bounds = array<i64: 2, 128, 64>}, {pipeline_mode = #tpu.pipeline_mode<synchronous>, transform_indices = @transform_13, window_bounds = array<i64: 2, 1, 64>}, {pipeline_mode = #tpu.pipeline_mode<synchronous>, transform_indices = @transform_14, window_bounds = array<i64: 2, 1, 64>}, {pipeline_mode = #tpu.pipeline_mode<synchronous>, transform_indices = @transform_15, window_bounds = array<i64: 2, 1, 64>}, {pipeline_mode = #tpu.pipeline_mode<synchronous>, transform_indices = @transform_16, window_bounds = array<i64: 64, 64>}, {pipeline_mode = #tpu.pipeline_mode<synchronous>, transform_indices = @transform_17, window_bounds = array<i64: 1, 64>}, {transform_indices = @transform_18, window_bounds = array<i64: 1, 1, 128>}]} {
    %c0 = arith.constant 0 : index
    %c0_0 = arith.constant 0 : index
    %c0_1 = arith.constant 0 : index
    %0 = vector.load %arg3[%c0, %c0_0, %c0_1] : memref<1x16x64xf32, #tpu.memory_space<vmem>>, vector<1x16x64xf32>
    %1 = vector.shape_cast %0 : vector<1x16x64xf32> to vector<16x64xf32>
    %c0_2 = arith.constant 0 : index
    %c0_3 = arith.constant 0 : index
    %2 = vector.load %arg5[%c0_2, %c0_3] : memref<1x64xf32, #tpu.memory_space<vmem>>, vector<1x64xf32>
    %c0_4 = arith.constant 0 : index
    %c0_5 = arith.constant 0 : index
    %3 = vector.load %arg6[%c0_4, %c0_5] : memref<1x64xf32, #tpu.memory_space<vmem>>, vector<1x64xf32>
    %cst = arith.constant dense<0.000000e+00> : vector<16xf32>
    %4 = vector.multi_reduction <add>, %1, %cst [1] : vector<16x64xf32> to vector<16xf32>
    %5 = vector.shape_cast %4 : vector<16xf32> to vector<16x1xf32>
    %cst_6 = arith.constant 6.400000e+01 : f32
    %6 = vector.broadcast %cst_6 : f32 to vector<16x1xf32>
    %7 = arith.divf %5, %6 : vector<16x1xf32>
    %8 = vector.broadcast %7 : vector<16x1xf32> to vector<16x64xf32>
    %9 = arith.subf %1, %8 : vector<16x64xf32>
    %10 = arith.mulf %9, %9 : vector<16x64xf32>
    %cst_7 = arith.constant dense<0.000000e+00> : vector<16xf32>
    %11 = vector.multi_reduction <add>, %10, %cst_7 [1] : vector<16x64xf32> to vector<16xf32>
    %12 = vector.shape_cast %11 : vector<16xf32> to vector<16x1xf32>
    %cst_8 = arith.constant 6.400000e+01 : f32
    %13 = vector.broadcast %cst_8 : f32 to vector<16x1xf32>
    %14 = arith.divf %12, %13 : vector<16x1xf32>
    %cst_9 = arith.constant 9.99999996E-13 : f32
    %15 = vector.broadcast %cst_9 : f32 to vector<16x1xf32>
    %16 = arith.addf %14, %15 : vector<16x1xf32>
    %17 = math.rsqrt %16 : vector<16x1xf32>
    %18 = vector.broadcast %17 : vector<16x1xf32> to vector<16x64xf32>
    %19 = arith.mulf %9, %18 : vector<16x64xf32>
    %20 = vector.broadcast %2 : vector<1x64xf32> to vector<16x64xf32>
    %21 = arith.mulf %19, %20 : vector<16x64xf32>
    %22 = vector.broadcast %3 : vector<1x64xf32> to vector<16x64xf32>
    %23 = arith.addf %21, %22 : vector<16x64xf32>
    %c0_10 = arith.constant 0 : index
    %c0_11 = arith.constant 0 : index
    %c0_12 = arith.constant 0 : index
    %24 = vector.load %arg4[%c0_10, %c0_11, %c0_12] : memref<1x1x16xf32, #tpu.memory_space<vmem>>, vector<1x1x16xf32>
    %25 = vector.shape_cast %24 : vector<1x1x16xf32> to vector<1x16xf32>
    %cst_13 = arith.constant 1.000000e+00 : f32
    %26 = vector.broadcast %cst_13 : f32 to vector<1x16xf32>
    %27 = arith.subf %26, %25 : vector<1x16xf32>
    %cst_14 = arith.constant -1.000000e+04 : f32
    %28 = vector.broadcast %cst_14 : f32 to vector<1x16xf32>
    %29 = arith.mulf %27, %28 : vector<1x16xf32>
    %30 = arith.truncf %23 : vector<16x64xf32> to vector<16x64xbf16>
    %c0_15 = arith.constant 0 : index
    %c0_16 = arith.constant 0 : index
    %c0_17 = arith.constant 0 : index
    %31 = vector.load %arg7[%c0_15, %c0_16, %c0_17] : memref<2x64x192xbf16, #tpu.memory_space<vmem>>, vector<1x64x192xbf16>
    %32 = vector.shape_cast %31 : vector<1x64x192xbf16> to vector<64x192xbf16>
    %cst_18 = arith.constant dense<0.000000e+00> : vector<16x192xf32>
    %33 = tpu.matmul %30, %32, %cst_18 {dimension_numbers = #tpu.dot_dimension_numbers<[1], [0], [0], [1], [0, 0, 1, 1], [], []>} : vector<16x64xbf16>, vector<64x192xbf16>, vector<16x192xf32> -> vector<16x192xf32>
    %c0_19 = arith.constant 0 : index
    %c0_20 = arith.constant 0 : index
    %c0_21 = arith.constant 0 : index
    %34 = vector.load %arg8[%c0_19, %c0_20, %c0_21] : memref<2x1x192xf32, #tpu.memory_space<vmem>>, vector<1x1x192xf32>
    %35 = vector.shape_cast %34 : vector<1x1x192xf32> to vector<1x192xf32>
    %36 = vector.broadcast %35 : vector<1x192xf32> to vector<16x192xf32>
    %37 = arith.addf %33, %36 : vector<16x192xf32>
    %38 = vector.extract_strided_slice %37 {offsets = [0, 0], sizes = [16, 16], strides = [1, 1]} : vector<16x192xf32> to vector<16x16xf32>
    %39 = arith.truncf %38 : vector<16x16xf32> to vector<16x16xbf16>
    %40 = vector.extract_strided_slice %37 {offsets = [0, 64], sizes = [16, 16], strides = [1, 1]} : vector<16x192xf32> to vector<16x16xf32>
    %41 = arith.truncf %40 : vector<16x16xf32> to vector<16x16xbf16>
    %42 = vector.extract_strided_slice %37 {offsets = [0, 128], sizes = [16, 16], strides = [1, 1]} : vector<16x192xf32> to vector<16x16xf32>
    %43 = arith.truncf %42 : vector<16x16xf32> to vector<16x16xbf16>
    %cst_22 = arith.constant dense<0.000000e+00> : vector<16x16xf32>
    %44 = tpu.matmul %39, %41, %cst_22 {dimension_numbers = #tpu.dot_dimension_numbers<[1], [1], [0], [0], [0, 0, 1, 0], [], []>} : vector<16x16xbf16>, vector<16x16xbf16>, vector<16x16xf32> -> vector<16x16xf32>
    %cst_23 = arith.constant 2.500000e-01 : f32
    %45 = vector.broadcast %cst_23 : f32 to vector<16x16xf32>
    %46 = arith.mulf %44, %45 : vector<16x16xf32>
    %47 = vector.broadcast %29 : vector<1x16xf32> to vector<16x16xf32>
    %48 = arith.addf %46, %47 : vector<16x16xf32>
    %cst_24 = arith.constant dense<0xFF800000> : vector<16xf32>
    %49 = vector.multi_reduction <maximumf>, %48, %cst_24 [1] : vector<16x16xf32> to vector<16xf32>
    %50 = vector.shape_cast %49 : vector<16xf32> to vector<16x1xf32>
    %51 = vector.broadcast %50 : vector<16x1xf32> to vector<16x16xf32>
    %52 = arith.subf %48, %51 : vector<16x16xf32>
    %53 = math.exp %52 : vector<16x16xf32>
    %cst_25 = arith.constant dense<0.000000e+00> : vector<16xf32>
    %54 = vector.multi_reduction <add>, %53, %cst_25 [1] : vector<16x16xf32> to vector<16xf32>
    %55 = vector.shape_cast %54 : vector<16xf32> to vector<16x1xf32>
    %56 = vector.broadcast %55 : vector<16x1xf32> to vector<16x16xf32>
    %57 = arith.divf %53, %56 : vector<16x16xf32>
    %58 = arith.truncf %57 : vector<16x16xf32> to vector<16x16xbf16>
    %cst_26 = arith.constant dense<0.000000e+00> : vector<16x16xf32>
    %59 = tpu.matmul %58, %43, %cst_26 {dimension_numbers = #tpu.dot_dimension_numbers<[1], [0], [0], [1], [0, 0, 1, 1], [], []>} : vector<16x16xbf16>, vector<16x16xbf16>, vector<16x16xf32> -> vector<16x16xf32>
    %60 = vector.extract_strided_slice %37 {offsets = [0, 16], sizes = [16, 16], strides = [1, 1]} : vector<16x192xf32> to vector<16x16xf32>
    %61 = arith.truncf %60 : vector<16x16xf32> to vector<16x16xbf16>
    %62 = vector.extract_strided_slice %37 {offsets = [0, 80], sizes = [16, 16], strides = [1, 1]} : vector<16x192xf32> to vector<16x16xf32>
    %63 = arith.truncf %62 : vector<16x16xf32> to vector<16x16xbf16>
    %64 = vector.extract_strided_slice %37 {offsets = [0, 144], sizes = [16, 16], strides = [1, 1]} : vector<16x192xf32> to vector<16x16xf32>
    %65 = arith.truncf %64 : vector<16x16xf32> to vector<16x16xbf16>
    %cst_27 = arith.constant dense<0.000000e+00> : vector<16x16xf32>
    %66 = tpu.matmul %61, %63, %cst_27 {dimension_numbers = #tpu.dot_dimension_numbers<[1], [1], [0], [0], [0, 0, 1, 0], [], []>} : vector<16x16xbf16>, vector<16x16xbf16>, vector<16x16xf32> -> vector<16x16xf32>
    %cst_28 = arith.constant 2.500000e-01 : f32
    %67 = vector.broadcast %cst_28 : f32 to vector<16x16xf32>
    %68 = arith.mulf %66, %67 : vector<16x16xf32>
    %69 = vector.broadcast %29 : vector<1x16xf32> to vector<16x16xf32>
    %70 = arith.addf %68, %69 : vector<16x16xf32>
    %cst_29 = arith.constant dense<0xFF800000> : vector<16xf32>
    %71 = vector.multi_reduction <maximumf>, %70, %cst_29 [1] : vector<16x16xf32> to vector<16xf32>
    %72 = vector.shape_cast %71 : vector<16xf32> to vector<16x1xf32>
    %73 = vector.broadcast %72 : vector<16x1xf32> to vector<16x16xf32>
    %74 = arith.subf %70, %73 : vector<16x16xf32>
    %75 = math.exp %74 : vector<16x16xf32>
    %cst_30 = arith.constant dense<0.000000e+00> : vector<16xf32>
    %76 = vector.multi_reduction <add>, %75, %cst_30 [1] : vector<16x16xf32> to vector<16xf32>
    %77 = vector.shape_cast %76 : vector<16xf32> to vector<16x1xf32>
    %78 = vector.broadcast %77 : vector<16x1xf32> to vector<16x16xf32>
    %79 = arith.divf %75, %78 : vector<16x16xf32>
    %80 = arith.truncf %79 : vector<16x16xf32> to vector<16x16xbf16>
    %cst_31 = arith.constant dense<0.000000e+00> : vector<16x16xf32>
    %81 = tpu.matmul %80, %65, %cst_31 {dimension_numbers = #tpu.dot_dimension_numbers<[1], [0], [0], [1], [0, 0, 1, 1], [], []>} : vector<16x16xbf16>, vector<16x16xbf16>, vector<16x16xf32> -> vector<16x16xf32>
    %82 = vector.extract_strided_slice %37 {offsets = [0, 32], sizes = [16, 16], strides = [1, 1]} : vector<16x192xf32> to vector<16x16xf32>
    %83 = arith.truncf %82 : vector<16x16xf32> to vector<16x16xbf16>
    %84 = vector.extract_strided_slice %37 {offsets = [0, 96], sizes = [16, 16], strides = [1, 1]} : vector<16x192xf32> to vector<16x16xf32>
    %85 = arith.truncf %84 : vector<16x16xf32> to vector<16x16xbf16>
    %86 = vector.extract_strided_slice %37 {offsets = [0, 160], sizes = [16, 16], strides = [1, 1]} : vector<16x192xf32> to vector<16x16xf32>
    %87 = arith.truncf %86 : vector<16x16xf32> to vector<16x16xbf16>
    %cst_32 = arith.constant dense<0.000000e+00> : vector<16x16xf32>
    %88 = tpu.matmul %83, %85, %cst_32 {dimension_numbers = #tpu.dot_dimension_numbers<[1], [1], [0], [0], [0, 0, 1, 0], [], []>} : vector<16x16xbf16>, vector<16x16xbf16>, vector<16x16xf32> -> vector<16x16xf32>
    %cst_33 = arith.constant 2.500000e-01 : f32
    %89 = vector.broadcast %cst_33 : f32 to vector<16x16xf32>
    %90 = arith.mulf %88, %89 : vector<16x16xf32>
    %91 = vector.broadcast %29 : vector<1x16xf32> to vector<16x16xf32>
    %92 = arith.addf %90, %91 : vector<16x16xf32>
    %cst_34 = arith.constant dense<0xFF800000> : vector<16xf32>
    %93 = vector.multi_reduction <maximumf>, %92, %cst_34 [1] : vector<16x16xf32> to vector<16xf32>
    %94 = vector.shape_cast %93 : vector<16xf32> to vector<16x1xf32>
    %95 = vector.broadcast %94 : vector<16x1xf32> to vector<16x16xf32>
    %96 = arith.subf %92, %95 : vector<16x16xf32>
    %97 = math.exp %96 : vector<16x16xf32>
    %cst_35 = arith.constant dense<0.000000e+00> : vector<16xf32>
    %98 = vector.multi_reduction <add>, %97, %cst_35 [1] : vector<16x16xf32> to vector<16xf32>
    %99 = vector.shape_cast %98 : vector<16xf32> to vector<16x1xf32>
    %100 = vector.broadcast %99 : vector<16x1xf32> to vector<16x16xf32>
    %101 = arith.divf %97, %100 : vector<16x16xf32>
    %102 = arith.truncf %101 : vector<16x16xf32> to vector<16x16xbf16>
    %cst_36 = arith.constant dense<0.000000e+00> : vector<16x16xf32>
    %103 = tpu.matmul %102, %87, %cst_36 {dimension_numbers = #tpu.dot_dimension_numbers<[1], [0], [0], [1], [0, 0, 1, 1], [], []>} : vector<16x16xbf16>, vector<16x16xbf16>, vector<16x16xf32> -> vector<16x16xf32>
    %104 = vector.extract_strided_slice %37 {offsets = [0, 48], sizes = [16, 16], strides = [1, 1]} : vector<16x192xf32> to vector<16x16xf32>
    %105 = arith.truncf %104 : vector<16x16xf32> to vector<16x16xbf16>
    %106 = vector.extract_strided_slice %37 {offsets = [0, 112], sizes = [16, 16], strides = [1, 1]} : vector<16x192xf32> to vector<16x16xf32>
    %107 = arith.truncf %106 : vector<16x16xf32> to vector<16x16xbf16>
    %108 = vector.extract_strided_slice %37 {offsets = [0, 176], sizes = [16, 16], strides = [1, 1]} : vector<16x192xf32> to vector<16x16xf32>
    %109 = arith.truncf %108 : vector<16x16xf32> to vector<16x16xbf16>
    %cst_37 = arith.constant dense<0.000000e+00> : vector<16x16xf32>
    %110 = tpu.matmul %105, %107, %cst_37 {dimension_numbers = #tpu.dot_dimension_numbers<[1], [1], [0], [0], [0, 0, 1, 0], [], []>} : vector<16x16xbf16>, vector<16x16xbf16>, vector<16x16xf32> -> vector<16x16xf32>
    %cst_38 = arith.constant 2.500000e-01 : f32
    %111 = vector.broadcast %cst_38 : f32 to vector<16x16xf32>
    %112 = arith.mulf %110, %111 : vector<16x16xf32>
    %113 = vector.broadcast %29 : vector<1x16xf32> to vector<16x16xf32>
    %114 = arith.addf %112, %113 : vector<16x16xf32>
    %cst_39 = arith.constant dense<0xFF800000> : vector<16xf32>
    %115 = vector.multi_reduction <maximumf>, %114, %cst_39 [1] : vector<16x16xf32> to vector<16xf32>
    %116 = vector.shape_cast %115 : vector<16xf32> to vector<16x1xf32>
    %117 = vector.broadcast %116 : vector<16x1xf32> to vector<16x16xf32>
    %118 = arith.subf %114, %117 : vector<16x16xf32>
    %119 = math.exp %118 : vector<16x16xf32>
    %cst_40 = arith.constant dense<0.000000e+00> : vector<16xf32>
    %120 = vector.multi_reduction <add>, %119, %cst_40 [1] : vector<16x16xf32> to vector<16xf32>
    %121 = vector.shape_cast %120 : vector<16xf32> to vector<16x1xf32>
    %122 = vector.broadcast %121 : vector<16x1xf32> to vector<16x16xf32>
    %123 = arith.divf %119, %122 : vector<16x16xf32>
    %124 = arith.truncf %123 : vector<16x16xf32> to vector<16x16xbf16>
    %cst_41 = arith.constant dense<0.000000e+00> : vector<16x16xf32>
    %125 = tpu.matmul %124, %109, %cst_41 {dimension_numbers = #tpu.dot_dimension_numbers<[1], [0], [0], [1], [0, 0, 1, 1], [], []>} : vector<16x16xbf16>, vector<16x16xbf16>, vector<16x16xf32> -> vector<16x16xf32>
    %126 = tpu.concatenate %59, %81, %103, %125 in 1 : vector<16x16xf32>, vector<16x16xf32>, vector<16x16xf32>, vector<16x16xf32> -> vector<16x64xf32>
    %127 = arith.truncf %126 : vector<16x64xf32> to vector<16x64xbf16>
    %c0_42 = arith.constant 0 : index
    %c0_43 = arith.constant 0 : index
    %c0_44 = arith.constant 0 : index
    %128 = vector.load %arg9[%c0_42, %c0_43, %c0_44] : memref<2x64x64xbf16, #tpu.memory_space<vmem>>, vector<1x64x64xbf16>
    %129 = vector.shape_cast %128 : vector<1x64x64xbf16> to vector<64x64xbf16>
    %cst_45 = arith.constant dense<0.000000e+00> : vector<16x64xf32>
    %130 = tpu.matmul %127, %129, %cst_45 {dimension_numbers = #tpu.dot_dimension_numbers<[1], [0], [0], [1], [0, 0, 1, 1], [], []>} : vector<16x64xbf16>, vector<64x64xbf16>, vector<16x64xf32> -> vector<16x64xf32>
    %c0_46 = arith.constant 0 : index
    %c0_47 = arith.constant 0 : index
    %c0_48 = arith.constant 0 : index
    %131 = vector.load %arg10[%c0_46, %c0_47, %c0_48] : memref<2x1x64xf32, #tpu.memory_space<vmem>>, vector<1x1x64xf32>
    %132 = vector.shape_cast %131 : vector<1x1x64xf32> to vector<1x64xf32>
    %133 = vector.broadcast %132 : vector<1x64xf32> to vector<16x64xf32>
    %134 = arith.addf %130, %133 : vector<16x64xf32>
    %135 = arith.addf %134, %23 : vector<16x64xf32>
    %c0_49 = arith.constant 0 : index
    %c0_50 = arith.constant 0 : index
    %c0_51 = arith.constant 0 : index
    %136 = vector.load %arg11[%c0_49, %c0_50, %c0_51] : memref<2x1x64xf32, #tpu.memory_space<vmem>>, vector<1x1x64xf32>
    %137 = vector.shape_cast %136 : vector<1x1x64xf32> to vector<1x64xf32>
    %c0_52 = arith.constant 0 : index
    %c0_53 = arith.constant 0 : index
    %c0_54 = arith.constant 0 : index
    %138 = vector.load %arg12[%c0_52, %c0_53, %c0_54] : memref<2x1x64xf32, #tpu.memory_space<vmem>>, vector<1x1x64xf32>
    %139 = vector.shape_cast %138 : vector<1x1x64xf32> to vector<1x64xf32>
    %cst_55 = arith.constant dense<0.000000e+00> : vector<16xf32>
    %140 = vector.multi_reduction <add>, %135, %cst_55 [1] : vector<16x64xf32> to vector<16xf32>
    %141 = vector.shape_cast %140 : vector<16xf32> to vector<16x1xf32>
    %cst_56 = arith.constant 6.400000e+01 : f32
    %142 = vector.broadcast %cst_56 : f32 to vector<16x1xf32>
    %143 = arith.divf %141, %142 : vector<16x1xf32>
    %144 = vector.broadcast %143 : vector<16x1xf32> to vector<16x64xf32>
    %145 = arith.subf %135, %144 : vector<16x64xf32>
    %146 = arith.mulf %145, %145 : vector<16x64xf32>
    %cst_57 = arith.constant dense<0.000000e+00> : vector<16xf32>
    %147 = vector.multi_reduction <add>, %146, %cst_57 [1] : vector<16x64xf32> to vector<16xf32>
    %148 = vector.shape_cast %147 : vector<16xf32> to vector<16x1xf32>
    %cst_58 = arith.constant 6.400000e+01 : f32
    %149 = vector.broadcast %cst_58 : f32 to vector<16x1xf32>
    %150 = arith.divf %148, %149 : vector<16x1xf32>
    %cst_59 = arith.constant 9.99999996E-13 : f32
    %151 = vector.broadcast %cst_59 : f32 to vector<16x1xf32>
    %152 = arith.addf %150, %151 : vector<16x1xf32>
    %153 = math.rsqrt %152 : vector<16x1xf32>
    %154 = vector.broadcast %153 : vector<16x1xf32> to vector<16x64xf32>
    %155 = arith.mulf %145, %154 : vector<16x64xf32>
    %156 = vector.broadcast %137 : vector<1x64xf32> to vector<16x64xf32>
    %157 = arith.mulf %155, %156 : vector<16x64xf32>
    %158 = vector.broadcast %139 : vector<1x64xf32> to vector<16x64xf32>
    %159 = arith.addf %157, %158 : vector<16x64xf32>
    %160 = arith.truncf %159 : vector<16x64xf32> to vector<16x64xbf16>
    %c0_60 = arith.constant 0 : index
    %c0_61 = arith.constant 0 : index
    %c0_62 = arith.constant 0 : index
    %161 = vector.load %arg13[%c0_60, %c0_61, %c0_62] : memref<2x64x128xbf16, #tpu.memory_space<vmem>>, vector<1x64x128xbf16>
    %162 = vector.shape_cast %161 : vector<1x64x128xbf16> to vector<64x128xbf16>
    %cst_63 = arith.constant dense<0.000000e+00> : vector<16x128xf32>
    %163 = tpu.matmul %160, %162, %cst_63 {dimension_numbers = #tpu.dot_dimension_numbers<[1], [0], [0], [1], [0, 0, 1, 1], [], []>} : vector<16x64xbf16>, vector<64x128xbf16>, vector<16x128xf32> -> vector<16x128xf32>
    %c0_64 = arith.constant 0 : index
    %c0_65 = arith.constant 0 : index
    %c0_66 = arith.constant 0 : index
    %164 = vector.load %arg14[%c0_64, %c0_65, %c0_66] : memref<2x1x128xf32, #tpu.memory_space<vmem>>, vector<1x1x128xf32>
    %165 = vector.shape_cast %164 : vector<1x1x128xf32> to vector<1x128xf32>
    %166 = vector.broadcast %165 : vector<1x128xf32> to vector<16x128xf32>
    %167 = arith.addf %163, %166 : vector<16x128xf32>
    %cst_67 = arith.constant 5.000000e-01 : f32
    %168 = vector.broadcast %cst_67 : f32 to vector<16x128xf32>
    %169 = arith.mulf %168, %167 : vector<16x128xf32>
    %cst_68 = arith.constant 4.471500e-02 : f32
    %170 = vector.broadcast %cst_68 : f32 to vector<16x128xf32>
    %171 = arith.mulf %170, %167 : vector<16x128xf32>
    %172 = arith.mulf %171, %167 : vector<16x128xf32>
    %173 = arith.mulf %172, %167 : vector<16x128xf32>
    %174 = arith.addf %167, %173 : vector<16x128xf32>
    %cst_69 = arith.constant 0.797884583 : f32
    %175 = vector.broadcast %cst_69 : f32 to vector<16x128xf32>
    %176 = arith.mulf %175, %174 : vector<16x128xf32>
    %177 = math.tanh %176 : vector<16x128xf32>
    %cst_70 = arith.constant 1.000000e+00 : f32
    %178 = vector.broadcast %cst_70 : f32 to vector<16x128xf32>
    %179 = arith.addf %178, %177 : vector<16x128xf32>
    %180 = arith.mulf %169, %179 : vector<16x128xf32>
    %181 = arith.truncf %180 : vector<16x128xf32> to vector<16x128xbf16>
    %c0_71 = arith.constant 0 : index
    %c0_72 = arith.constant 0 : index
    %c0_73 = arith.constant 0 : index
    %182 = vector.load %arg15[%c0_71, %c0_72, %c0_73] : memref<2x128x64xbf16, #tpu.memory_space<vmem>>, vector<1x128x64xbf16>
    %183 = vector.shape_cast %182 : vector<1x128x64xbf16> to vector<128x64xbf16>
    %cst_74 = arith.constant dense<0.000000e+00> : vector<16x64xf32>
    %184 = tpu.matmul %181, %183, %cst_74 {dimension_numbers = #tpu.dot_dimension_numbers<[1], [0], [0], [1], [0, 0, 1, 1], [], []>} : vector<16x128xbf16>, vector<128x64xbf16>, vector<16x64xf32> -> vector<16x64xf32>
    %c0_75 = arith.constant 0 : index
    %c0_76 = arith.constant 0 : index
    %c0_77 = arith.constant 0 : index
    %185 = vector.load %arg16[%c0_75, %c0_76, %c0_77] : memref<2x1x64xf32, #tpu.memory_space<vmem>>, vector<1x1x64xf32>
    %186 = vector.shape_cast %185 : vector<1x1x64xf32> to vector<1x64xf32>
    %187 = vector.broadcast %186 : vector<1x64xf32> to vector<16x64xf32>
    %188 = arith.addf %184, %187 : vector<16x64xf32>
    %189 = arith.addf %188, %159 : vector<16x64xf32>
    %c0_78 = arith.constant 0 : index
    %c0_79 = arith.constant 0 : index
    %c0_80 = arith.constant 0 : index
    %190 = vector.load %arg17[%c0_78, %c0_79, %c0_80] : memref<2x1x64xf32, #tpu.memory_space<vmem>>, vector<1x1x64xf32>
    %191 = vector.shape_cast %190 : vector<1x1x64xf32> to vector<1x64xf32>
    %c0_81 = arith.constant 0 : index
    %c0_82 = arith.constant 0 : index
    %c0_83 = arith.constant 0 : index
    %192 = vector.load %arg18[%c0_81, %c0_82, %c0_83] : memref<2x1x64xf32, #tpu.memory_space<vmem>>, vector<1x1x64xf32>
    %193 = vector.shape_cast %192 : vector<1x1x64xf32> to vector<1x64xf32>
    %cst_84 = arith.constant dense<0.000000e+00> : vector<16xf32>
    %194 = vector.multi_reduction <add>, %189, %cst_84 [1] : vector<16x64xf32> to vector<16xf32>
    %195 = vector.shape_cast %194 : vector<16xf32> to vector<16x1xf32>
    %cst_85 = arith.constant 6.400000e+01 : f32
    %196 = vector.broadcast %cst_85 : f32 to vector<16x1xf32>
    %197 = arith.divf %195, %196 : vector<16x1xf32>
    %198 = vector.broadcast %197 : vector<16x1xf32> to vector<16x64xf32>
    %199 = arith.subf %189, %198 : vector<16x64xf32>
    %200 = arith.mulf %199, %199 : vector<16x64xf32>
    %cst_86 = arith.constant dense<0.000000e+00> : vector<16xf32>
    %201 = vector.multi_reduction <add>, %200, %cst_86 [1] : vector<16x64xf32> to vector<16xf32>
    %202 = vector.shape_cast %201 : vector<16xf32> to vector<16x1xf32>
    %cst_87 = arith.constant 6.400000e+01 : f32
    %203 = vector.broadcast %cst_87 : f32 to vector<16x1xf32>
    %204 = arith.divf %202, %203 : vector<16x1xf32>
    %cst_88 = arith.constant 9.99999996E-13 : f32
    %205 = vector.broadcast %cst_88 : f32 to vector<16x1xf32>
    %206 = arith.addf %204, %205 : vector<16x1xf32>
    %207 = math.rsqrt %206 : vector<16x1xf32>
    %208 = vector.broadcast %207 : vector<16x1xf32> to vector<16x64xf32>
    %209 = arith.mulf %199, %208 : vector<16x64xf32>
    %210 = vector.broadcast %191 : vector<1x64xf32> to vector<16x64xf32>
    %211 = arith.mulf %209, %210 : vector<16x64xf32>
    %212 = vector.broadcast %193 : vector<1x64xf32> to vector<16x64xf32>
    %213 = arith.addf %211, %212 : vector<16x64xf32>
    %214 = arith.truncf %213 : vector<16x64xf32> to vector<16x64xbf16>
    %c1 = arith.constant 1 : index
    %c0_89 = arith.constant 0 : index
    %c0_90 = arith.constant 0 : index
    %215 = vector.load %arg7[%c1, %c0_89, %c0_90] : memref<2x64x192xbf16, #tpu.memory_space<vmem>>, vector<1x64x192xbf16>
    %216 = vector.shape_cast %215 : vector<1x64x192xbf16> to vector<64x192xbf16>
    %cst_91 = arith.constant dense<0.000000e+00> : vector<16x192xf32>
    %217 = tpu.matmul %214, %216, %cst_91 {dimension_numbers = #tpu.dot_dimension_numbers<[1], [0], [0], [1], [0, 0, 1, 1], [], []>} : vector<16x64xbf16>, vector<64x192xbf16>, vector<16x192xf32> -> vector<16x192xf32>
    %c1_92 = arith.constant 1 : index
    %c0_93 = arith.constant 0 : index
    %c0_94 = arith.constant 0 : index
    %218 = vector.load %arg8[%c1_92, %c0_93, %c0_94] : memref<2x1x192xf32, #tpu.memory_space<vmem>>, vector<1x1x192xf32>
    %219 = vector.shape_cast %218 : vector<1x1x192xf32> to vector<1x192xf32>
    %220 = vector.broadcast %219 : vector<1x192xf32> to vector<16x192xf32>
    %221 = arith.addf %217, %220 : vector<16x192xf32>
    %222 = vector.extract_strided_slice %221 {offsets = [0, 0], sizes = [16, 16], strides = [1, 1]} : vector<16x192xf32> to vector<16x16xf32>
    %223 = arith.truncf %222 : vector<16x16xf32> to vector<16x16xbf16>
    %224 = vector.extract_strided_slice %221 {offsets = [0, 64], sizes = [16, 16], strides = [1, 1]} : vector<16x192xf32> to vector<16x16xf32>
    %225 = arith.truncf %224 : vector<16x16xf32> to vector<16x16xbf16>
    %226 = vector.extract_strided_slice %221 {offsets = [0, 128], sizes = [16, 16], strides = [1, 1]} : vector<16x192xf32> to vector<16x16xf32>
    %227 = arith.truncf %226 : vector<16x16xf32> to vector<16x16xbf16>
    %cst_95 = arith.constant dense<0.000000e+00> : vector<16x16xf32>
    %228 = tpu.matmul %223, %225, %cst_95 {dimension_numbers = #tpu.dot_dimension_numbers<[1], [1], [0], [0], [0, 0, 1, 0], [], []>} : vector<16x16xbf16>, vector<16x16xbf16>, vector<16x16xf32> -> vector<16x16xf32>
    %cst_96 = arith.constant 2.500000e-01 : f32
    %229 = vector.broadcast %cst_96 : f32 to vector<16x16xf32>
    %230 = arith.mulf %228, %229 : vector<16x16xf32>
    %231 = vector.broadcast %29 : vector<1x16xf32> to vector<16x16xf32>
    %232 = arith.addf %230, %231 : vector<16x16xf32>
    %cst_97 = arith.constant dense<0xFF800000> : vector<16xf32>
    %233 = vector.multi_reduction <maximumf>, %232, %cst_97 [1] : vector<16x16xf32> to vector<16xf32>
    %234 = vector.shape_cast %233 : vector<16xf32> to vector<16x1xf32>
    %235 = vector.broadcast %234 : vector<16x1xf32> to vector<16x16xf32>
    %236 = arith.subf %232, %235 : vector<16x16xf32>
    %237 = math.exp %236 : vector<16x16xf32>
    %cst_98 = arith.constant dense<0.000000e+00> : vector<16xf32>
    %238 = vector.multi_reduction <add>, %237, %cst_98 [1] : vector<16x16xf32> to vector<16xf32>
    %239 = vector.shape_cast %238 : vector<16xf32> to vector<16x1xf32>
    %240 = vector.broadcast %239 : vector<16x1xf32> to vector<16x16xf32>
    %241 = arith.divf %237, %240 : vector<16x16xf32>
    %242 = arith.truncf %241 : vector<16x16xf32> to vector<16x16xbf16>
    %cst_99 = arith.constant dense<0.000000e+00> : vector<16x16xf32>
    %243 = tpu.matmul %242, %227, %cst_99 {dimension_numbers = #tpu.dot_dimension_numbers<[1], [0], [0], [1], [0, 0, 1, 1], [], []>} : vector<16x16xbf16>, vector<16x16xbf16>, vector<16x16xf32> -> vector<16x16xf32>
    %244 = vector.extract_strided_slice %221 {offsets = [0, 16], sizes = [16, 16], strides = [1, 1]} : vector<16x192xf32> to vector<16x16xf32>
    %245 = arith.truncf %244 : vector<16x16xf32> to vector<16x16xbf16>
    %246 = vector.extract_strided_slice %221 {offsets = [0, 80], sizes = [16, 16], strides = [1, 1]} : vector<16x192xf32> to vector<16x16xf32>
    %247 = arith.truncf %246 : vector<16x16xf32> to vector<16x16xbf16>
    %248 = vector.extract_strided_slice %221 {offsets = [0, 144], sizes = [16, 16], strides = [1, 1]} : vector<16x192xf32> to vector<16x16xf32>
    %249 = arith.truncf %248 : vector<16x16xf32> to vector<16x16xbf16>
    %cst_100 = arith.constant dense<0.000000e+00> : vector<16x16xf32>
    %250 = tpu.matmul %245, %247, %cst_100 {dimension_numbers = #tpu.dot_dimension_numbers<[1], [1], [0], [0], [0, 0, 1, 0], [], []>} : vector<16x16xbf16>, vector<16x16xbf16>, vector<16x16xf32> -> vector<16x16xf32>
    %cst_101 = arith.constant 2.500000e-01 : f32
    %251 = vector.broadcast %cst_101 : f32 to vector<16x16xf32>
    %252 = arith.mulf %250, %251 : vector<16x16xf32>
    %253 = vector.broadcast %29 : vector<1x16xf32> to vector<16x16xf32>
    %254 = arith.addf %252, %253 : vector<16x16xf32>
    %cst_102 = arith.constant dense<0xFF800000> : vector<16xf32>
    %255 = vector.multi_reduction <maximumf>, %254, %cst_102 [1] : vector<16x16xf32> to vector<16xf32>
    %256 = vector.shape_cast %255 : vector<16xf32> to vector<16x1xf32>
    %257 = vector.broadcast %256 : vector<16x1xf32> to vector<16x16xf32>
    %258 = arith.subf %254, %257 : vector<16x16xf32>
    %259 = math.exp %258 : vector<16x16xf32>
    %cst_103 = arith.constant dense<0.000000e+00> : vector<16xf32>
    %260 = vector.multi_reduction <add>, %259, %cst_103 [1] : vector<16x16xf32> to vector<16xf32>
    %261 = vector.shape_cast %260 : vector<16xf32> to vector<16x1xf32>
    %262 = vector.broadcast %261 : vector<16x1xf32> to vector<16x16xf32>
    %263 = arith.divf %259, %262 : vector<16x16xf32>
    %264 = arith.truncf %263 : vector<16x16xf32> to vector<16x16xbf16>
    %cst_104 = arith.constant dense<0.000000e+00> : vector<16x16xf32>
    %265 = tpu.matmul %264, %249, %cst_104 {dimension_numbers = #tpu.dot_dimension_numbers<[1], [0], [0], [1], [0, 0, 1, 1], [], []>} : vector<16x16xbf16>, vector<16x16xbf16>, vector<16x16xf32> -> vector<16x16xf32>
    %266 = vector.extract_strided_slice %221 {offsets = [0, 32], sizes = [16, 16], strides = [1, 1]} : vector<16x192xf32> to vector<16x16xf32>
    %267 = arith.truncf %266 : vector<16x16xf32> to vector<16x16xbf16>
    %268 = vector.extract_strided_slice %221 {offsets = [0, 96], sizes = [16, 16], strides = [1, 1]} : vector<16x192xf32> to vector<16x16xf32>
    %269 = arith.truncf %268 : vector<16x16xf32> to vector<16x16xbf16>
    %270 = vector.extract_strided_slice %221 {offsets = [0, 160], sizes = [16, 16], strides = [1, 1]} : vector<16x192xf32> to vector<16x16xf32>
    %271 = arith.truncf %270 : vector<16x16xf32> to vector<16x16xbf16>
    %cst_105 = arith.constant dense<0.000000e+00> : vector<16x16xf32>
    %272 = tpu.matmul %267, %269, %cst_105 {dimension_numbers = #tpu.dot_dimension_numbers<[1], [1], [0], [0], [0, 0, 1, 0], [], []>} : vector<16x16xbf16>, vector<16x16xbf16>, vector<16x16xf32> -> vector<16x16xf32>
    %cst_106 = arith.constant 2.500000e-01 : f32
    %273 = vector.broadcast %cst_106 : f32 to vector<16x16xf32>
    %274 = arith.mulf %272, %273 : vector<16x16xf32>
    %275 = vector.broadcast %29 : vector<1x16xf32> to vector<16x16xf32>
    %276 = arith.addf %274, %275 : vector<16x16xf32>
    %cst_107 = arith.constant dense<0xFF800000> : vector<16xf32>
    %277 = vector.multi_reduction <maximumf>, %276, %cst_107 [1] : vector<16x16xf32> to vector<16xf32>
    %278 = vector.shape_cast %277 : vector<16xf32> to vector<16x1xf32>
    %279 = vector.broadcast %278 : vector<16x1xf32> to vector<16x16xf32>
    %280 = arith.subf %276, %279 : vector<16x16xf32>
    %281 = math.exp %280 : vector<16x16xf32>
    %cst_108 = arith.constant dense<0.000000e+00> : vector<16xf32>
    %282 = vector.multi_reduction <add>, %281, %cst_108 [1] : vector<16x16xf32> to vector<16xf32>
    %283 = vector.shape_cast %282 : vector<16xf32> to vector<16x1xf32>
    %284 = vector.broadcast %283 : vector<16x1xf32> to vector<16x16xf32>
    %285 = arith.divf %281, %284 : vector<16x16xf32>
    %286 = arith.truncf %285 : vector<16x16xf32> to vector<16x16xbf16>
    %cst_109 = arith.constant dense<0.000000e+00> : vector<16x16xf32>
    %287 = tpu.matmul %286, %271, %cst_109 {dimension_numbers = #tpu.dot_dimension_numbers<[1], [0], [0], [1], [0, 0, 1, 1], [], []>} : vector<16x16xbf16>, vector<16x16xbf16>, vector<16x16xf32> -> vector<16x16xf32>
    %288 = vector.extract_strided_slice %221 {offsets = [0, 48], sizes = [16, 16], strides = [1, 1]} : vector<16x192xf32> to vector<16x16xf32>
    %289 = arith.truncf %288 : vector<16x16xf32> to vector<16x16xbf16>
    %290 = vector.extract_strided_slice %221 {offsets = [0, 112], sizes = [16, 16], strides = [1, 1]} : vector<16x192xf32> to vector<16x16xf32>
    %291 = arith.truncf %290 : vector<16x16xf32> to vector<16x16xbf16>
    %292 = vector.extract_strided_slice %221 {offsets = [0, 176], sizes = [16, 16], strides = [1, 1]} : vector<16x192xf32> to vector<16x16xf32>
    %293 = arith.truncf %292 : vector<16x16xf32> to vector<16x16xbf16>
    %cst_110 = arith.constant dense<0.000000e+00> : vector<16x16xf32>
    %294 = tpu.matmul %289, %291, %cst_110 {dimension_numbers = #tpu.dot_dimension_numbers<[1], [1], [0], [0], [0, 0, 1, 0], [], []>} : vector<16x16xbf16>, vector<16x16xbf16>, vector<16x16xf32> -> vector<16x16xf32>
    %cst_111 = arith.constant 2.500000e-01 : f32
    %295 = vector.broadcast %cst_111 : f32 to vector<16x16xf32>
    %296 = arith.mulf %294, %295 : vector<16x16xf32>
    %297 = vector.broadcast %29 : vector<1x16xf32> to vector<16x16xf32>
    %298 = arith.addf %296, %297 : vector<16x16xf32>
    %cst_112 = arith.constant dense<0xFF800000> : vector<16xf32>
    %299 = vector.multi_reduction <maximumf>, %298, %cst_112 [1] : vector<16x16xf32> to vector<16xf32>
    %300 = vector.shape_cast %299 : vector<16xf32> to vector<16x1xf32>
    %301 = vector.broadcast %300 : vector<16x1xf32> to vector<16x16xf32>
    %302 = arith.subf %298, %301 : vector<16x16xf32>
    %303 = math.exp %302 : vector<16x16xf32>
    %cst_113 = arith.constant dense<0.000000e+00> : vector<16xf32>
    %304 = vector.multi_reduction <add>, %303, %cst_113 [1] : vector<16x16xf32> to vector<16xf32>
    %305 = vector.shape_cast %304 : vector<16xf32> to vector<16x1xf32>
    %306 = vector.broadcast %305 : vector<16x1xf32> to vector<16x16xf32>
    %307 = arith.divf %303, %306 : vector<16x16xf32>
    %308 = arith.truncf %307 : vector<16x16xf32> to vector<16x16xbf16>
    %cst_114 = arith.constant dense<0.000000e+00> : vector<16x16xf32>
    %309 = tpu.matmul %308, %293, %cst_114 {dimension_numbers = #tpu.dot_dimension_numbers<[1], [0], [0], [1], [0, 0, 1, 1], [], []>} : vector<16x16xbf16>, vector<16x16xbf16>, vector<16x16xf32> -> vector<16x16xf32>
    %310 = tpu.concatenate %243, %265, %287, %309 in 1 : vector<16x16xf32>, vector<16x16xf32>, vector<16x16xf32>, vector<16x16xf32> -> vector<16x64xf32>
    %311 = arith.truncf %310 : vector<16x64xf32> to vector<16x64xbf16>
    %c1_115 = arith.constant 1 : index
    %c0_116 = arith.constant 0 : index
    %c0_117 = arith.constant 0 : index
    %312 = vector.load %arg9[%c1_115, %c0_116, %c0_117] : memref<2x64x64xbf16, #tpu.memory_space<vmem>>, vector<1x64x64xbf16>
    %313 = vector.shape_cast %312 : vector<1x64x64xbf16> to vector<64x64xbf16>
    %cst_118 = arith.constant dense<0.000000e+00> : vector<16x64xf32>
    %314 = tpu.matmul %311, %313, %cst_118 {dimension_numbers = #tpu.dot_dimension_numbers<[1], [0], [0], [1], [0, 0, 1, 1], [], []>} : vector<16x64xbf16>, vector<64x64xbf16>, vector<16x64xf32> -> vector<16x64xf32>
    %c1_119 = arith.constant 1 : index
    %c0_120 = arith.constant 0 : index
    %c0_121 = arith.constant 0 : index
    %315 = vector.load %arg10[%c1_119, %c0_120, %c0_121] : memref<2x1x64xf32, #tpu.memory_space<vmem>>, vector<1x1x64xf32>
    %316 = vector.shape_cast %315 : vector<1x1x64xf32> to vector<1x64xf32>
    %317 = vector.broadcast %316 : vector<1x64xf32> to vector<16x64xf32>
    %318 = arith.addf %314, %317 : vector<16x64xf32>
    %319 = arith.addf %318, %213 : vector<16x64xf32>
    %c1_122 = arith.constant 1 : index
    %c0_123 = arith.constant 0 : index
    %c0_124 = arith.constant 0 : index
    %320 = vector.load %arg11[%c1_122, %c0_123, %c0_124] : memref<2x1x64xf32, #tpu.memory_space<vmem>>, vector<1x1x64xf32>
    %321 = vector.shape_cast %320 : vector<1x1x64xf32> to vector<1x64xf32>
    %c1_125 = arith.constant 1 : index
    %c0_126 = arith.constant 0 : index
    %c0_127 = arith.constant 0 : index
    %322 = vector.load %arg12[%c1_125, %c0_126, %c0_127] : memref<2x1x64xf32, #tpu.memory_space<vmem>>, vector<1x1x64xf32>
    %323 = vector.shape_cast %322 : vector<1x1x64xf32> to vector<1x64xf32>
    %cst_128 = arith.constant dense<0.000000e+00> : vector<16xf32>
    %324 = vector.multi_reduction <add>, %319, %cst_128 [1] : vector<16x64xf32> to vector<16xf32>
    %325 = vector.shape_cast %324 : vector<16xf32> to vector<16x1xf32>
    %cst_129 = arith.constant 6.400000e+01 : f32
    %326 = vector.broadcast %cst_129 : f32 to vector<16x1xf32>
    %327 = arith.divf %325, %326 : vector<16x1xf32>
    %328 = vector.broadcast %327 : vector<16x1xf32> to vector<16x64xf32>
    %329 = arith.subf %319, %328 : vector<16x64xf32>
    %330 = arith.mulf %329, %329 : vector<16x64xf32>
    %cst_130 = arith.constant dense<0.000000e+00> : vector<16xf32>
    %331 = vector.multi_reduction <add>, %330, %cst_130 [1] : vector<16x64xf32> to vector<16xf32>
    %332 = vector.shape_cast %331 : vector<16xf32> to vector<16x1xf32>
    %cst_131 = arith.constant 6.400000e+01 : f32
    %333 = vector.broadcast %cst_131 : f32 to vector<16x1xf32>
    %334 = arith.divf %332, %333 : vector<16x1xf32>
    %cst_132 = arith.constant 9.99999996E-13 : f32
    %335 = vector.broadcast %cst_132 : f32 to vector<16x1xf32>
    %336 = arith.addf %334, %335 : vector<16x1xf32>
    %337 = math.rsqrt %336 : vector<16x1xf32>
    %338 = vector.broadcast %337 : vector<16x1xf32> to vector<16x64xf32>
    %339 = arith.mulf %329, %338 : vector<16x64xf32>
    %340 = vector.broadcast %321 : vector<1x64xf32> to vector<16x64xf32>
    %341 = arith.mulf %339, %340 : vector<16x64xf32>
    %342 = vector.broadcast %323 : vector<1x64xf32> to vector<16x64xf32>
    %343 = arith.addf %341, %342 : vector<16x64xf32>
    %344 = arith.truncf %343 : vector<16x64xf32> to vector<16x64xbf16>
    %c1_133 = arith.constant 1 : index
    %c0_134 = arith.constant 0 : index
    %c0_135 = arith.constant 0 : index
    %345 = vector.load %arg13[%c1_133, %c0_134, %c0_135] : memref<2x64x128xbf16, #tpu.memory_space<vmem>>, vector<1x64x128xbf16>
    %346 = vector.shape_cast %345 : vector<1x64x128xbf16> to vector<64x128xbf16>
    %cst_136 = arith.constant dense<0.000000e+00> : vector<16x128xf32>
    %347 = tpu.matmul %344, %346, %cst_136 {dimension_numbers = #tpu.dot_dimension_numbers<[1], [0], [0], [1], [0, 0, 1, 1], [], []>} : vector<16x64xbf16>, vector<64x128xbf16>, vector<16x128xf32> -> vector<16x128xf32>
    %c1_137 = arith.constant 1 : index
    %c0_138 = arith.constant 0 : index
    %c0_139 = arith.constant 0 : index
    %348 = vector.load %arg14[%c1_137, %c0_138, %c0_139] : memref<2x1x128xf32, #tpu.memory_space<vmem>>, vector<1x1x128xf32>
    %349 = vector.shape_cast %348 : vector<1x1x128xf32> to vector<1x128xf32>
    %350 = vector.broadcast %349 : vector<1x128xf32> to vector<16x128xf32>
    %351 = arith.addf %347, %350 : vector<16x128xf32>
    %cst_140 = arith.constant 5.000000e-01 : f32
    %352 = vector.broadcast %cst_140 : f32 to vector<16x128xf32>
    %353 = arith.mulf %352, %351 : vector<16x128xf32>
    %cst_141 = arith.constant 4.471500e-02 : f32
    %354 = vector.broadcast %cst_141 : f32 to vector<16x128xf32>
    %355 = arith.mulf %354, %351 : vector<16x128xf32>
    %356 = arith.mulf %355, %351 : vector<16x128xf32>
    %357 = arith.mulf %356, %351 : vector<16x128xf32>
    %358 = arith.addf %351, %357 : vector<16x128xf32>
    %cst_142 = arith.constant 0.797884583 : f32
    %359 = vector.broadcast %cst_142 : f32 to vector<16x128xf32>
    %360 = arith.mulf %359, %358 : vector<16x128xf32>
    %361 = math.tanh %360 : vector<16x128xf32>
    %cst_143 = arith.constant 1.000000e+00 : f32
    %362 = vector.broadcast %cst_143 : f32 to vector<16x128xf32>
    %363 = arith.addf %362, %361 : vector<16x128xf32>
    %364 = arith.mulf %353, %363 : vector<16x128xf32>
    %365 = arith.truncf %364 : vector<16x128xf32> to vector<16x128xbf16>
    %c1_144 = arith.constant 1 : index
    %c0_145 = arith.constant 0 : index
    %c0_146 = arith.constant 0 : index
    %366 = vector.load %arg15[%c1_144, %c0_145, %c0_146] : memref<2x128x64xbf16, #tpu.memory_space<vmem>>, vector<1x128x64xbf16>
    %367 = vector.shape_cast %366 : vector<1x128x64xbf16> to vector<128x64xbf16>
    %cst_147 = arith.constant dense<0.000000e+00> : vector<16x64xf32>
    %368 = tpu.matmul %365, %367, %cst_147 {dimension_numbers = #tpu.dot_dimension_numbers<[1], [0], [0], [1], [0, 0, 1, 1], [], []>} : vector<16x128xbf16>, vector<128x64xbf16>, vector<16x64xf32> -> vector<16x64xf32>
    %c1_148 = arith.constant 1 : index
    %c0_149 = arith.constant 0 : index
    %c0_150 = arith.constant 0 : index
    %369 = vector.load %arg16[%c1_148, %c0_149, %c0_150] : memref<2x1x64xf32, #tpu.memory_space<vmem>>, vector<1x1x64xf32>
    %370 = vector.shape_cast %369 : vector<1x1x64xf32> to vector<1x64xf32>
    %371 = vector.broadcast %370 : vector<1x64xf32> to vector<16x64xf32>
    %372 = arith.addf %368, %371 : vector<16x64xf32>
    %373 = arith.addf %372, %343 : vector<16x64xf32>
    %c1_151 = arith.constant 1 : index
    %c0_152 = arith.constant 0 : index
    %c0_153 = arith.constant 0 : index
    %374 = vector.load %arg17[%c1_151, %c0_152, %c0_153] : memref<2x1x64xf32, #tpu.memory_space<vmem>>, vector<1x1x64xf32>
    %375 = vector.shape_cast %374 : vector<1x1x64xf32> to vector<1x64xf32>
    %c1_154 = arith.constant 1 : index
    %c0_155 = arith.constant 0 : index
    %c0_156 = arith.constant 0 : index
    %376 = vector.load %arg18[%c1_154, %c0_155, %c0_156] : memref<2x1x64xf32, #tpu.memory_space<vmem>>, vector<1x1x64xf32>
    %377 = vector.shape_cast %376 : vector<1x1x64xf32> to vector<1x64xf32>
    %cst_157 = arith.constant dense<0.000000e+00> : vector<16xf32>
    %378 = vector.multi_reduction <add>, %373, %cst_157 [1] : vector<16x64xf32> to vector<16xf32>
    %379 = vector.shape_cast %378 : vector<16xf32> to vector<16x1xf32>
    %cst_158 = arith.constant 6.400000e+01 : f32
    %380 = vector.broadcast %cst_158 : f32 to vector<16x1xf32>
    %381 = arith.divf %379, %380 : vector<16x1xf32>
    %382 = vector.broadcast %381 : vector<16x1xf32> to vector<16x64xf32>
    %383 = arith.subf %373, %382 : vector<16x64xf32>
    %384 = arith.mulf %383, %383 : vector<16x64xf32>
    %cst_159 = arith.constant dense<0.000000e+00> : vector<16xf32>
    %385 = vector.multi_reduction <add>, %384, %cst_159 [1] : vector<16x64xf32> to vector<16xf32>
    %386 = vector.shape_cast %385 : vector<16xf32> to vector<16x1xf32>
    %cst_160 = arith.constant 6.400000e+01 : f32
    %387 = vector.broadcast %cst_160 : f32 to vector<16x1xf32>
    %388 = arith.divf %386, %387 : vector<16x1xf32>
    %cst_161 = arith.constant 9.99999996E-13 : f32
    %389 = vector.broadcast %cst_161 : f32 to vector<16x1xf32>
    %390 = arith.addf %388, %389 : vector<16x1xf32>
    %391 = math.rsqrt %390 : vector<16x1xf32>
    %392 = vector.broadcast %391 : vector<16x1xf32> to vector<16x64xf32>
    %393 = arith.mulf %383, %392 : vector<16x64xf32>
    %394 = vector.broadcast %375 : vector<1x64xf32> to vector<16x64xf32>
    %395 = arith.mulf %393, %394 : vector<16x64xf32>
    %396 = vector.broadcast %377 : vector<1x64xf32> to vector<16x64xf32>
    %397 = arith.addf %395, %396 : vector<16x64xf32>
    %c0_162 = arith.constant 0 : index
    %c0_163 = arith.constant 0 : index
    %398 = vector.load %arg22[%c0_162, %c0_163] : memref<16x64xf32, #tpu.memory_space<vmem>>, vector<16x64xf32>
    tpu.vector_store %arg22[%c0_162, %c0_163], %397 {strides = array<i32>} : memref<16x64xf32, #tpu.memory_space<vmem>>, vector<16x64xf32>,
    %399 = arith.index_cast %arg0 : i32 to index
    %400 = memref.load %arg1[%399] : memref<2xi32, #tpu.memory_space<smem>>
    %401 = arith.index_cast %arg0 : i32 to index
    %402 = memref.load %arg2[%401] : memref<2xi32, #tpu.memory_space<smem>>
    %403 = arith.index_cast %400 : i32 to index
    %c0_164 = arith.constant 0 : index
    %404 = vector.load %arg22[%403, %c0_164] : memref<16x64xf32, #tpu.memory_space<vmem>>, vector<1x64xf32>
    %405 = arith.index_cast %402 : i32 to index
    %c0_165 = arith.constant 0 : index
    %406 = vector.load %arg22[%405, %c0_165] : memref<16x64xf32, #tpu.memory_space<vmem>>, vector<1x64xf32>
    %407 = tpu.concatenate %404, %406 in 1 : vector<1x64xf32>, vector<1x64xf32> -> vector<1x128xf32>
    %c0_166 = arith.constant 0 : index
    %c0_167 = arith.constant 0 : index
    %c0_168 = arith.constant 0 : index
    %408 = vector.load %arg21[%c0_166, %c0_167, %c0_168] : memref<1x1x128xf32, #tpu.memory_space<vmem>>, vector<1x1x128xf32>
    %409 = vector.shape_cast %408 : vector<1x1x128xf32> to vector<1x128xf32>
    %410 = vector.shape_cast %407 : vector<1x128xf32> to vector<1x1x128xf32>
    tpu.vector_store %arg21[%c0_166, %c0_167, %c0_168], %410 {strides = array<i32>} : memref<1x1x128xf32, #tpu.memory_space<vmem>>, vector<1x1x128xf32>,
    return
  }
  func.func @transform_0(%arg0: i32, %arg1: memref<2xi32, #tpu.memory_space<smem>>, %arg2: memref<2xi32, #tpu.memory_space<smem>>) -> (i32, i32, i32) {
    %c0_i32 = arith.constant 0 : i32
    %c0_i32_0 = arith.constant 0 : i32
    %c0_i32_1 = arith.constant 0 : i32
    return %arg0, %c0_i32, %c0_i32_0 : i32, i32, i32
  }
  func.func @transform_1(%arg0: i32, %arg1: memref<2xi32, #tpu.memory_space<smem>>, %arg2: memref<2xi32, #tpu.memory_space<smem>>) -> (i32, i32, i32) {
    %c0_i32 = arith.constant 0 : i32
    %c0_i32_0 = arith.constant 0 : i32
    %c0_i32_1 = arith.constant 0 : i32
    return %arg0, %c0_i32, %c0_i32_0 : i32, i32, i32
  }
  func.func @transform_2(%arg0: i32, %arg1: memref<2xi32, #tpu.memory_space<smem>>, %arg2: memref<2xi32, #tpu.memory_space<smem>>) -> (i32, i32) {
    %c0_i32 = arith.constant 0 : i32
    %c0_i32_0 = arith.constant 0 : i32
    %c0_i32_1 = arith.constant 0 : i32
    return %c0_i32, %c0_i32_0 : i32, i32
  }
  func.func @transform_3(%arg0: i32, %arg1: memref<2xi32, #tpu.memory_space<smem>>, %arg2: memref<2xi32, #tpu.memory_space<smem>>) -> (i32, i32) {
    %c0_i32 = arith.constant 0 : i32
    %c0_i32_0 = arith.constant 0 : i32
    %c0_i32_1 = arith.constant 0 : i32
    return %c0_i32, %c0_i32_0 : i32, i32
  }
  func.func @transform_4(%arg0: i32, %arg1: memref<2xi32, #tpu.memory_space<smem>>, %arg2: memref<2xi32, #tpu.memory_space<smem>>) -> (i32, i32, i32) {
    %c0_i32 = arith.constant 0 : i32
    %c0_i32_0 = arith.constant 0 : i32
    %c0_i32_1 = arith.constant 0 : i32
    %c0_i32_2 = arith.constant 0 : i32
    return %c0_i32, %c0_i32_0, %c0_i32_1 : i32, i32, i32
  }
  func.func @transform_5(%arg0: i32, %arg1: memref<2xi32, #tpu.memory_space<smem>>, %arg2: memref<2xi32, #tpu.memory_space<smem>>) -> (i32, i32, i32) {
    %c0_i32 = arith.constant 0 : i32
    %c0_i32_0 = arith.constant 0 : i32
    %c0_i32_1 = arith.constant 0 : i32
    %c0_i32_2 = arith.constant 0 : i32
    return %c0_i32, %c0_i32_0, %c0_i32_1 : i32, i32, i32
  }
  func.func @transform_6(%arg0: i32, %arg1: memref<2xi32, #tpu.memory_space<smem>>, %arg2: memref<2xi32, #tpu.memory_space<smem>>) -> (i32, i32, i32) {
    %c0_i32 = arith.constant 0 : i32
    %c0_i32_0 = arith.constant 0 : i32
    %c0_i32_1 = arith.constant 0 : i32
    %c0_i32_2 = arith.constant 0 : i32
    return %c0_i32, %c0_i32_0, %c0_i32_1 : i32, i32, i32
  }
  func.func @transform_7(%arg0: i32, %arg1: memref<2xi32, #tpu.memory_space<smem>>, %arg2: memref<2xi32, #tpu.memory_space<smem>>) -> (i32, i32, i32) {
    %c0_i32 = arith.constant 0 : i32
    %c0_i32_0 = arith.constant 0 : i32
    %c0_i32_1 = arith.constant 0 : i32
    %c0_i32_2 = arith.constant 0 : i32
    return %c0_i32, %c0_i32_0, %c0_i32_1 : i32, i32, i32
  }
  func.func @transform_8(%arg0: i32, %arg1: memref<2xi32, #tpu.memory_space<smem>>, %arg2: memref<2xi32, #tpu.memory_space<smem>>) -> (i32, i32, i32) {
    %c0_i32 = arith.constant 0 : i32
    %c0_i32_0 = arith.constant 0 : i32
    %c0_i32_1 = arith.constant 0 : i32
    %c0_i32_2 = arith.constant 0 : i32
    return %c0_i32, %c0_i32_0, %c0_i32_1 : i32, i32, i32
  }
  func.func @transform_9(%arg0: i32, %arg1: memref<2xi32, #tpu.memory_space<smem>>, %arg2: memref<2xi32, #tpu.memory_space<smem>>) -> (i32, i32, i32) {
    %c0_i32 = arith.constant 0 : i32
    %c0_i32_0 = arith.constant 0 : i32
    %c0_i32_1 = arith.constant 0 : i32
    %c0_i32_2 = arith.constant 0 : i32
    return %c0_i32, %c0_i32_0, %c0_i32_1 : i32, i32, i32
  }
  func.func @transform_10(%arg0: i32, %arg1: memref<2xi32, #tpu.memory_space<smem>>, %arg2: memref<2xi32, #tpu.memory_space<smem>>) -> (i32, i32, i32) {
    %c0_i32 = arith.constant 0 : i32
    %c0_i32_0 = arith.constant 0 : i32
    %c0_i32_1 = arith.constant 0 : i32
    %c0_i32_2 = arith.constant 0 : i32
    return %c0_i32, %c0_i32_0, %c0_i32_1 : i32, i32, i32
  }
  func.func @transform_11(%arg0: i32, %arg1: memref<2xi32, #tpu.memory_space<smem>>, %arg2: memref<2xi32, #tpu.memory_space<smem>>) -> (i32, i32, i32) {
    %c0_i32 = arith.constant 0 : i32
    %c0_i32_0 = arith.constant 0 : i32
    %c0_i32_1 = arith.constant 0 : i32
    %c0_i32_2 = arith.constant 0 : i32
    return %c0_i32, %c0_i32_0, %c0_i32_1 : i32, i32, i32
  }
  func.func @transform_12(%arg0: i32, %arg1: memref<2xi32, #tpu.memory_space<smem>>, %arg2: memref<2xi32, #tpu.memory_space<smem>>) -> (i32, i32, i32) {
    %c0_i32 = arith.constant 0 : i32
    %c0_i32_0 = arith.constant 0 : i32
    %c0_i32_1 = arith.constant 0 : i32
    %c0_i32_2 = arith.constant 0 : i32
    return %c0_i32, %c0_i32_0, %c0_i32_1 : i32, i32, i32
  }
  func.func @transform_13(%arg0: i32, %arg1: memref<2xi32, #tpu.memory_space<smem>>, %arg2: memref<2xi32, #tpu.memory_space<smem>>) -> (i32, i32, i32) {
    %c0_i32 = arith.constant 0 : i32
    %c0_i32_0 = arith.constant 0 : i32
    %c0_i32_1 = arith.constant 0 : i32
    %c0_i32_2 = arith.constant 0 : i32
    return %c0_i32, %c0_i32_0, %c0_i32_1 : i32, i32, i32
  }
  func.func @transform_14(%arg0: i32, %arg1: memref<2xi32, #tpu.memory_space<smem>>, %arg2: memref<2xi32, #tpu.memory_space<smem>>) -> (i32, i32, i32) {
    %c0_i32 = arith.constant 0 : i32
    %c0_i32_0 = arith.constant 0 : i32
    %c0_i32_1 = arith.constant 0 : i32
    %c0_i32_2 = arith.constant 0 : i32
    return %c0_i32, %c0_i32_0, %c0_i32_1 : i32, i32, i32
  }
  func.func @transform_15(%arg0: i32, %arg1: memref<2xi32, #tpu.memory_space<smem>>, %arg2: memref<2xi32, #tpu.memory_space<smem>>) -> (i32, i32, i32) {
    %c0_i32 = arith.constant 0 : i32
    %c0_i32_0 = arith.constant 0 : i32
    %c0_i32_1 = arith.constant 0 : i32
    %c0_i32_2 = arith.constant 0 : i32
    return %c0_i32, %c0_i32_0, %c0_i32_1 : i32, i32, i32
  }
  func.func @transform_16(%arg0: i32, %arg1: memref<2xi32, #tpu.memory_space<smem>>, %arg2: memref<2xi32, #tpu.memory_space<smem>>) -> (i32, i32) {
    %c0_i32 = arith.constant 0 : i32
    %c0_i32_0 = arith.constant 0 : i32
    %c0_i32_1 = arith.constant 0 : i32
    return %c0_i32, %c0_i32_0 : i32, i32
  }
  func.func @transform_17(%arg0: i32, %arg1: memref<2xi32, #tpu.memory_space<smem>>, %arg2: memref<2xi32, #tpu.memory_space<smem>>) -> (i32, i32) {
    %c0_i32 = arith.constant 0 : i32
    %c0_i32_0 = arith.constant 0 : i32
    %c0_i32_1 = arith.constant 0 : i32
    return %c0_i32, %c0_i32_0 : i32, i32
  }
  func.func @transform_18(%arg0: i32, %arg1: memref<2xi32, #tpu.memory_space<smem>>, %arg2: memref<2xi32, #tpu.memory_space<smem>>) -> (i32, i32, i32) {
    %c0_i32 = arith.constant 0 : i32
    %c0_i32_0 = arith.constant 0 : i32
    %c0_i32_1 = arith.constant 0 : i32
    return %arg0, %c0_i32, %c0_i32_0 : i32, i32, i32
  }
}

</mosaic_0001>

<bundles_post_ra>
// kernel: tpu_custom_call.1
= control target key start
LH: loop header
LB: loop body
LE: loop exit
PB: predicated region body
PF: predicated region fallthrough
CT: control target
= control target key end

     0   :  { %s4860_s0 = inlined_call_operand.hbm [shape: s32[2], index: 0, kind: input, shape index: {}]   ;;  %s4861_s2 = inlined_call_operand.hbm [shape: f32[2,16,64], index: 2, kind: input, shape index: {}]   ;;  %s4862_s3 = inlined_call_operand.vmem [shape: f32[2,1,16], index: 3, kind: input, shape index: {}]   ;;  %s4863_s4 = inlined_call_operand.hbm [shape: f32[1,64], index: 4, kind: input, shape index: {}]   ;;  %s4864_s5 = inlined_call_operand.hbm [shape: f32[1,64], index: 5, kind: input, shape index: {}]   ;;  %s4865_s6 = inlined_call_operand.vmem [shape: bf16[2,64,192], index: 6, kind: input, shape index: {}]   ;;  %s4866_s7 = inlined_call_operand.hbm [shape: f32[2,1,192], index: 7, kind: input, shape index: {}]   ;;  %s4867_s8 = inlined_call_operand.vmem [shape: bf16[2,64,64], index: 8, kind: input, shape index: {}]   ;;  %s4868_s9 = inlined_call_operand.hbm [shape: f32[2,1,64], index: 9, kind: input, shape index: {}]   ;;  %s4869_s10 = inlined_call_operand.vmem [shape: f32[2,1,64], index: 10, kind: input, shape index: {}]   ;;  %s4870_s11 = inlined_call_operand.vmem [shape: f32[2,1,64], index: 11, kind: input, shape index: {}]   ;;  %s4871_s12 = inlined_call_operand.hbm [shape: bf16[2,64,128], index: 12, kind: input, shape index: {}]   ;;  %s4872_s13 = inlined_call_operand.vmem [shape: f32[2,1,128], index: 13, kind: input, shape index: {}]   ;;  %s4873_s14 = inlined_call_operand.vmem [shape: bf16[2,128,64], index: 14, kind: input, shape index: {}]   ;;  %s4874_s15 = inlined_call_operand.vmem [shape: f32[2,1,64], index: 15, kind: input, shape index: {}]   ;;  %s4875_s16 = inlined_call_operand.vmem [shape: f32[2,1,64], index: 16, kind: input, shape index: {}]   ;;  %s4876_s17 = inlined_call_operand.vmem [shape: f32[2,1,64], index: 17, kind: input, shape index: {}]   ;;  %s4877_s18 = inlined_call_operand.vmem [shape: bf16[64,64], index: 18, kind: input, shape index: {}]   ;;  %s4878_s19 = inlined_call_operand.vmem [shape: f32[1,64], index: 19, kind: input, shape index: {}]   ;;  %s4879_s20 = inlined_call_operand.hbm [shape: f32[2,1,128], index: 20, kind: output, shape index: {}]   ;;  %s4880_s1 = inlined_call_operand.hbm [shape: s32[2], index: 1, kind: input, shape index: {}]  }
   0x1   :  { %4909 = sst [smem:[#allocation24_spill]] %s4860_s0 }
   0x2   :  { %4910 = sst [smem:[#allocation25_spill]] %s4861_s2  ;;  %s4920_s23 = sld [smem:[#allocation24_spill]] }
   0x3   :  { %4911 = sst [smem:[#allocation26_spill]] %s4862_s3 }
   0x4   :  { %4912 = sst [smem:[#allocation27_spill]] %s4863_s4 }
   0x5   :  { %4913 = sst [smem:[#allocation28_spill]] %s4864_s5 }
   0x6   :  { %4914 = sst [smem:[#allocation29_spill]] %s4865_s6 }
   0x7   :  { %4915 = sst [smem:[#allocation30_spill]] %s4866_s7 }
   0x8   :  { %4916 = sst [smem:[#allocation31_spill]] %s4874_s15  ;;  %s3658_s15 = scalar_lea.hbm %s4920_s23, 16 }
   0x9   :  { %4917 = sst [smem:[#allocation32_spill]] %s4875_s16  ;;  %p3659_p0 = scmp.ne.s32.totalorder %s4920_s23, %s3658_s15 }
   0xa   :  { %4918 = sst [smem:[#allocation33_spill]] %s4876_s17  ;;  %p3662_p1 = scmp.lt.u32.totalorder %s3658_s15, %s4920_s23 }
   0xb   :  { %4919 = sst [smem:[#allocation34_spill]] %s4879_s20 }
   0xc   :  { %p3664_p2 = pnand %p3662_p1, %p3659_p0 }
   0xe   :  { %3667 = shalt.err (!%p3664_p2)  }
   0xf   :  { %s3930_s18 = smov [#allocation4]   ;;  %s3668_s5 = scalar_lea.hbm %s4880_s1, 16 }
  0x10   :  { %26 = dma.hbm_to_smem %s4920_s23, 16, %s3930_s18, [#allocation3] }
  0x11   :  { %p3669_p3 = scmp.ne.s32.totalorder %s4880_s1, %s3668_s5  ;;  %p3672_p4 = scmp.lt.u32.totalorder %s3668_s5, %s4880_s1 }
  0x13   :  { %p3674_p5 = pnand %p3672_p4, %p3669_p3 }
  0x15   :  { %3677 = shalt.err (!%p3674_p5)  }
  0x16   :  { %s3931_s15 = smov [#allocation5]  }
  0x17   :  { %28 = dma.hbm_to_smem %s4880_s1, 16, %s3931_s15, [#allocation3] }
  0x18   :  { %3892 = dma.done.wait [#allocation3], 32 }
  0x19   :  { %3893 = vsyncadd [#allocation3], 4294967264 }
  0x1a   :  { %30 = sfence }
  0x1b   :  { %31 = vsyncpa [#allocation7], 0 }
  0x1c   :  { %33 = vsyncpa [#allocation7 + $0x1], 0 }
  0x1d   :  { %34 = vsyncpa [#allocation10], 0 }
  0x1e   :  { %35 = vsyncpa [#allocation13], 0 }
  0x1f   :  { %36 = vsyncpa [#allocation16], 0 }
  0x20   :  { %37 = vsyncpa [#allocation8], 0 }
  0x21   :  { %39 = vsyncpa [#allocation8 + $0x1], 0  ;;  %s4086_s23 = smov 0   ;;  %s4088_s24 = smov 0  }
  0x22   :  { %s4090_s3 = smov 0   ;;  %s4092_s25 = smov 0  }
  0x23 LB: > { %s3932_s1 = smov [#allocation9]   ;;  %s4107_s18 = sadd.s32 4294967295, %s3928_s25   ;;  %s3928_s25 = sphi %s4092_s25, %s4959_s25   ;;  %s3924_s3 = sphi %s4090_s3, %s4958_s3   ;;  %s3920_s24 = sphi %s4088_s24, %s4957_s24   ;;  %s3916_s23 = sphi %s4086_s23, %s4956_s23  }
  0x24   : > { %s477_s4 = sshll.u32 %s3932_s1, 4  ;;  %p2964_p6 = scmp.ge.s32.totalorder %s3928_s25, 1  ;;  %s4112_s4 = int_to_ptr.vmem [resolvable:$true] %s477_s4 }
  0x25   : > { %p4890_p7 = scmp.eq.s32.totalorder %s4107_s18, 0  ;;  %p464_p8 = scmp.lt.s32.totalorder %s3928_s25, 3 }
  0x26   : > { %s3933_s26 = smov [#allocation12]   ;;  %s3934_s5 = smov [#allocation11]  }
  0x27   : > { %p4114_p9 = pnand %p2964_p6, %p464_p8  ;;  %s501_s27 = sshll.u32 %s3933_s26, 4  ;;  %s4121_s27 = int_to_ptr.vmem [resolvable:$true] %s501_s27 }
  0x28   : > { %s488_s29 = sshll.u32 %s3934_s5, 4  ;;  %s4923_s21 = sld [smem:[#allocation27_spill]]  ;;  %s4129_s29 = int_to_ptr.vmem [resolvable:$true] %s488_s29 }
  0x29   : > { %s4921_s19 = scalar_select %p4114_p9, 1, 0 }
  0x2a   : > { %p3387_p11 = pneg %p4114_p9 }
  0x2c   : > { %p4125_p12 = pnand %p3387_p11, %p4890_p7 }
  0x2e   : > { %s3678_s15 = scalar_lea.hbm %s4923_s21, 16  ;;  %p4139_p0 = pneg %p4125_p12 }
  0x2f   : > { %p3679_p13 = scmp.ne.s32.totalorder %s4923_s21, %s3678_s15  ;;  %p3685_p3 = scmp.lt.u32.totalorder %s3678_s15, %s4923_s21 }
  0x31   : > { %p3681_p1 = pnand %p4139_p0, %p3679_p13 }
  0x33   : > { %p3682_p2 = pneg %p3681_p1 }
  0x35   : > { %p3687_p4 = pnand %p3685_p3, %p3682_p2 }
  0x37   : > { %3690 = shalt.err (!%p3687_p4)
}
  0x38   : > { %s3691_s30 = scalar_lea.vmem %s4112_s4, 16  ;;  %s3698_s0 = scalar_lea.vmem %s4112_s4, 32 }
  0x39   : > { %p3692_p5 = scmp.ne.s32.totalorder %s4112_s4, %s3691_s30  ;;  %p3699_p11 = scmp.lt.s32.totalorder %s4112_s4, %s4112_s4 }
  0x3a   : > { %p3700_p13 = scmp.lt.s32.totalorder %s3698_s0, %s3691_s30 }
  0x3b   : > { %p3694_p6 = pnand %p3692_p5, %p4139_p0 }
  0x3c   : > { %p3701_p1 = por %p3700_p13, %p3699_p11 }
  0x3d   : > { %p3695_p8 = pneg %p3694_p6 }
  0x3f   : > { %p3702_p10 = pnand %p3701_p1, %p3695_p8 }
  0x41   : > { %3705 = shalt.err (!%p3702_p10)
}
  0x42   : > { %3390 = dma.hbm_to_vmem [thread:$0]  (!%p4125_p12), %s4923_s21, 16, %s4112_s4, [#allocation10]  }
  0x43   : > { %s4925_s7 = sld [smem:[#allocation30_spill]] }
  0x49   : > { %s3706_s5 = scalar_lea.hbm %s4925_s7, 64 }
  0x4a   : > { %p3707_p2 = scmp.ne.s32.totalorder %s4925_s7, %s3706_s5  ;;  %p3713_p10 = scmp.lt.u32.totalorder %s3706_s5, %s4925_s7 }
  0x4c   : > { %p3709_p3 = pnand %p3707_p2, %p4139_p0 }
  0x4e   : > { %p3710_p4 = pneg %p3709_p3 }
  0x50   : > { %p3715_p5 = pnand %p3713_p10, %p3710_p4 }
  0x52   : > { %3718 = shalt.err (!%p3715_p5)
}
  0x53   : > { %s3719_s4 = scalar_lea.vmem %s4121_s27, 64  ;;  %p3727_p13 = scmp.lt.s32.totalorder %s4121_s27, %s4121_s27 }
  0x54   : > { %p3720_p6 = scmp.ne.s32.totalorder %s4121_s27, %s3719_s4  ;;  %p3728_p1 = scmp.lt.s32.totalorder %s3719_s4, %s3719_s4 }
  0x56   : > { %p3722_p8 = pnand %p3720_p6, %p4139_p0  ;;  %p3729_p2 = por %p3728_p1, %p3727_p13 }
  0x58   : > { %p3723_p11 = pneg %p3722_p8 }
  0x5a   : > { %p3730_p3 = pnand %p3729_p2, %p3723_p11 }
  0x5c   : > { %3733 = shalt.err (!%p3730_p3)
}
  0x5d   : > { %s3935_s17 = smov 32   ;;  %s3936_s20 = smov 2  }
  0x5e   : > { %3396 = dma.hbm_to_vmem [thread:$0]  (!%p4125_p12), %s4925_s7, 64, %s4121_s27, [#allocation13], %s3935_s17, %s3935_s17, %s3936_s20  }
  0x5f   : > { %s4926_s5 = sld [smem:[#allocation28_spill]] }
  0x65   : > { %s3734_s30 = scalar_lea.hbm %s4926_s5, 16 }
  0x66   : > { %p3735_p4 = scmp.ne.s32.totalorder %s4926_s5, %s3734_s30  ;;  %p3741_p6 = scmp.lt.u32.totalorder %s3734_s30, %s4926_s5 }
  0x68   : > { %p3737_p10 = pnand %p3735_p4, %p4139_p0 }
  0x6a   : > { %p3738_p5 = pneg %p3737_p10 }
  0x6c   : > { %p3743_p8 = pnand %p3741_p6, %p3738_p5 }
  0x6e   : > { %3746 = shalt.err (!%p3743_p8)
}
  0x6f   : > { %s3747_s27 = scalar_lea.vmem %s4129_s29, 16  ;;  %s3754_s21 = scalar_lea.vmem %s4129_s29, 32 }
  0x70   : > { %p3748_p11 = scmp.ne.s32.totalorder %s4129_s29, %s3747_s27  ;;  %p3755_p2 = scmp.lt.s32.totalorder %s4129_s29, %s4129_s29 }
  0x71   : > { %p3756_p3 = scmp.lt.s32.totalorder %s3754_s21, %s3747_s27 }
  0x72   : > { %p3750_p13 = pnand %p3748_p11, %p4139_p0 }
  0x73   : > { %p3757_p4 = por %p3756_p3, %p3755_p2 }
  0x74   : > { %p3751_p1 = pneg %p3750_p13 }
  0x76   : > { %p3758_p10 = pnand %p3757_p4, %p3751_p1 }
  0x78   : > { %3761 = shalt.err (!%p3758_p10)
}
  0x79   : > { %3393 = dma.hbm_to_vmem [thread:$0]  (!%p4125_p12), %s4926_s5, 16, %s4129_s29, [#allocation10]  }
  0x7a   : > { %s3937_s20 = smov [#allocation14]   ;;  %s3762_s26 = scalar_lea.hbm %s4868_s9, 32 }
  0x7b   : > { %s517_s15 = sshll.u32 %s3937_s20, 4  ;;  %p3763_p5 = scmp.ne.s32.totalorder %s4868_s9, %s3762_s26  ;;  %s518_s15 = int_to_ptr.vmem [resolvable:$true] %s517_s15 }
  0x7c   : > { %p3769_p11 = scmp.lt.u32.totalorder %s3762_s26, %s4868_s9 }
  0x7d   : > { %p3765_p6 = pnand %p3763_p5, %p4139_p0 }
  0x7f   : > { %p3766_p8 = pneg %p3765_p6 }
  0x81   : > { %p3771_p13 = pnand %p3769_p11, %p3766_p8 }
  0x83   : > { %3774 = shalt.err (!%p3771_p13)
}
  0x84   : > { %s3775_s29 = scalar_lea.vmem %s518_s15, 32  ;;  %p3783_p4 = scmp.lt.s32.totalorder %s518_s15, %s518_s15 }
  0x85   : > { %p3776_p1 = scmp.ne.s32.totalorder %s518_s15, %s3775_s29  ;;  %p3784_p10 = scmp.lt.s32.totalorder %s3775_s29, %s3775_s29 }
  0x87   : > { %p3778_p2 = pnand %p3776_p1, %p4139_p0  ;;  %p3785_p7 = por %p3784_p10, %p3783_p4 }
  0x89   : > { %p3779_p3 = pneg %p3778_p2 }
  0x8b   : > { %p3786_p9 = pnand %p3785_p7, %p3779_p3 }
  0x8d   : > { %3789 = shalt.err (!%p3786_p9)
}
  0x8e   : > { %s3938_s21 = smov 16   ;;  %s3939_s16 = smov 1  }
  0x8f   : > { %3399 = dma.hbm_to_vmem [thread:$0]  (!%p4125_p12), %s4868_s9, 32, %s518_s15, [#allocation13], %s3938_s21, %s3938_s21, %s3939_s16  }
  0x90   : > { %s3940_s2 = smov [#allocation15]   ;;  %s3790_s0 = scalar_lea.hbm %s4871_s12, 1024 }
  0x91   : > { %s536_s22 = sshll.u32 %s3940_s2, 4  ;;  %p3791_p7 = scmp.ne.s32.totalorder %s4871_s12, %s3790_s0  ;;  %s537_s22 = int_to_ptr.vmem [resolvable:$true] %s536_s22 }
  0x92   : > { %p3797_p6 = scmp.lt.u32.totalorder %s3790_s0, %s4871_s12 }
  0x93   : > { %p3793_p9 = pnand %p3791_p7, %p4139_p0 }
  0x95   : > { %p3794_p5 = pneg %p3793_p9 }
  0x97   : > { %p3799_p8 = pnand %p3797_p6, %p3794_p5 }
  0x99   : > { %3802 = shalt.err (!%p3799_p8)
}
  0x9a   : > { %s3803_s15 = scalar_lea.vmem %s537_s22, 1024  ;;  %p3811_p2 = scmp.lt.s32.totalorder %s537_s22, %s537_s22 }
  0x9b   : > { %p3804_p11 = scmp.ne.s32.totalorder %s537_s22, %s3803_s15  ;;  %p3812_p3 = scmp.lt.s32.totalorder %s3803_s15, %s3803_s15 }
  0x9d   : > { %p3806_p13 = pnand %p3804_p11, %p4139_p0  ;;  %p3813_p4 = por %p3812_p3, %p3811_p2 }
  0x9f   : > { %p3807_p1 = pneg %p3806_p13 }
  0xa1   : > { %p3814_p10 = pnand %p3813_p4, %p3807_p1 }
  0xa3   : > { %3817 = shalt.err (!%p3814_p10)
}
  0xa4   : > { %s3941_s21 = smov 64   ;;  %s3942_s1 = smov 4  }
  0xa5   : > { %3402 = dma.hbm_to_vmem [thread:$0]  (!%p4125_p12), %s4871_s12, 1024, %s537_s22, [#allocation16], %s3941_s21, %s3941_s21, %s3942_s1  }
  0xa6   : > { %s2963_s17 = sadd.s32 4294967294, %s3928_s25   ;;  %s4246_s20 = sadd.s32 1, %s3928_s25  }
  0xa7   : > { %s52_s2 = sadd.s32 1, %s3924_s3  ;;  %s49_s26 = ssub.s32 %s3928_s25, %s4246_s20 }
  0xa8   : > { %p59_p0 = scmp.ne.s32.totalorder %s3924_s3, %s3920_s24  ;;  %p50_p7 = scmp.eq.s32.totalorder %s49_s26, 0 }
  0xa9   : > { %p60_p9 = scmp.eq.s32.totalorder %s3928_s25, 0  ;;  %p65_p5 = scmp.ne.s32.totalorder %s3920_s24, %s3916_s23 }
  0xaa   : > { %p451_p6 = scmp.eq.s32.totalorder %s4107_s18, 1  ;;  %p4927_p11 = scmp.eq.s32.totalorder %s4107_s18, 0 }
  0xab   : > { %s4258_s30 = scalar_select %p50_p7, %s3924_s3, %s52_s2  }
  0xac   : > { %p61_p8 = por %p60_p9, %p59_p0  ;;  %p4262_p13 = por %p4927_p11, %p65_p5 }
  0xad   : > { %p4266_p12 = por %p451_p6, %p59_p0  ;;  %p457_p1 = scmp.eq.s32.totalorder %s2963_s17, 1 }
  0xae   : > { %p3416_p2 = scmp.lt.s32.totalorder %s3928_s25, 2  ;;  %s571_s0 = sand.u32 1, %s3924_s3  }
  0xaf   : > { %s4929_s22 = scalar_select %p4266_p12, 1, 0 }
  0xb0   : > { %p4272_p3 = por %p457_p1, %p65_p5  ;;  %s2971_s27 = sshll.u32 %s571_s0, 4 }
  0xb1   : > { %s3108_s29 = sshll.u32 %s3928_s25, 8  ;;  %s4931_s1 = sld [smem:[#allocation25_spill]] }
  0xb2   : > { %s4930_s4 = scalar_select %p4272_p3, 1, 0 }
  0xb3   : > { %s575_s16 = scalar_lea.vmem [#allocation6], %s2971_s27  ;;  %p4282_p4 = pnand %p3416_p2, %p61_p8 }
  0xb4   : > { %s582_s2 = sshll.u32 %s575_s16, 4  ;;  %s4288_s26 = scalar_lea.sflag [#allocation7], %s571_s0  ;;  %s4286_s2 = int_to_ptr.vmem [resolvable:$true] %s582_s2 }
  0xb5   : > { %p3820_p0 = pneg %p4282_p4 }
  0xb7   : > { %s4280_s5 = scalar_lea.hbm %s4931_s1, %s3108_s29  ;;  %s3823_s15 = scalar_lea.hbm %s4931_s1, 512 }
  0xb8   : > { %s3818_s7 = scalar_lea.hbm %s4280_s5, 256  ;;  %p3824_p5 = scmp.lt.u32.totalorder %s4280_s5, %s4931_s1 }
  0xb9   : > { %p3819_p10 = scmp.ne.s32.totalorder %s4280_s5, %s3818_s7  ;;  %p3825_p6 = scmp.lt.u32.totalorder %s3823_s15, %s3818_s7 }
  0xba   : > { %p3827_p11 = scmp.lt.u32.totalorder %s3818_s7, %s4280_s5 }
  0xbb   : > { %p3821_p7 = pnand %p3820_p0, %p3819_p10  ;;  %p3826_p8 = por %p3825_p6, %p3824_p5 }
  0xbd   : > { %p3822_p9 = pneg %p3821_p7  ;;  %p3828_p1 = por %p3827_p11, %p3826_p8 }
  0xbf   : > { %p3829_p2 = pnand %p3828_p1, %p3822_p9 }
  0xc1   : > { %3832 = shalt.err (!%p3829_p2)
}
  0xc2   : > { %s3833_s0 = scalar_lea.vmem %s4286_s2, 256  ;;  %s3943_s27 = smov [#allocation6]  }
  0xc3   : > { %p3834_p10 = scmp.ne.s32.totalorder %s4286_s2, %s3833_s0  ;;  %s3838_s29 = sshll.u32 %s3943_s27, 4  ;;  %s3839_s29 = int_to_ptr.vmem [resolvable:$false] %s3838_s29 }
  0xc4   : > { %s3840_s21 = scalar_lea.vmem %s3839_s29, 512  ;;  %p3841_p12 = scmp.lt.s32.totalorder %s4286_s2, %s3839_s29 }
  0xc5   : > { %p3836_p7 = pnand %p3834_p10, %p3820_p0  ;;  %p3842_p5 = scmp.lt.s32.totalorder %s3840_s21, %s3833_s0 }
  0xc7   : > { %p3837_p3 = pneg %p3836_p7  ;;  %p3843_p6 = por %p3842_p5, %p3841_p12 }
  0xc9   : > { %p3844_p8 = pnand %p3843_p6, %p3837_p3 }
  0xcb   : > { %3847 = shalt.err (!%p3844_p8)
}
  0xcc   : > { %s3944_s7 = smov 128   ;;  %s3945_s15 = smov 8  }
  0xcd   : > { %3406 = dma.hbm_to_vmem [thread:$0]  (!%p4282_p4), %s4280_s5, 256, %s4286_s2, %s4288_s26, %s3944_s7, %s3944_s7, %s3945_s15  }
  0xce   : > { %p4933_p0 = scmp.ne.s32.totalorder %s4921_s19, 0 }
  0xcf   : > { %s4319_s16 = sand.u32 (!%p4933_p0), 1, %s3920_s24  }
  0xd0   : > { %600 = sbr.rel (%p4933_p0) target bundleno = 5856 (0x16e0), region = 92  ;;  %s2975_s0 = sshll.u32 (!%p4933_p0), %s4319_s16, 4 }
  0xd1   : > { %s603_s27 = scalar_lea.sflag (!%p4933_p0), [#allocation7], %s4319_s16  ;;  %s606_s29 = scalar_lea.vmem (!%p4933_p0), [#allocation6], %s2975_s0 }
  0xd7   : > { %3895 = dma.done.wait (%p4262_p13), %s603_s27, 256  }
  0xd8   : > { %3897 = vsyncadd (%p4262_p13), %s603_s27, 4294967040  ;;  %p4934_p12 = scmp.eq.s32.totalorder %s4107_s18, 0 }
  0xda   : > { %3899 = dma.done.wait (%p4934_p12), [#allocation10], 32   ;;  %p4935_p3 = pmov %p4934_p12 }
  0xdc   : > { %3901 = vsyncadd (%p4935_p3), [#allocation10], 4294967264  ;;  %p4936_p4 = pmov %p4935_p3 }
  0xdd   : > { %p4937_p9 = pmov %p4935_p3 }
  0xde   : > { %3903 = dma.done.wait (%p4936_p4), [#allocation13], 96  }
  0xdf   : > { %3905 = vsyncadd (%p4937_p9), [#allocation13], 4294967200  ;;  %p4938_p11 = pmov %p4935_p3 }
  0xe0   : > { %p4939_p1 = pmov %p4935_p3 }
  0xe1   : > { %3907 = dma.done.wait (%p4938_p11), [#allocation16], 1024  }
  0xe2   : > { %3909 = vsyncadd (%p4939_p1), [#allocation16], 4294966272  ;;  %vm689_vm0 = vcmask 523264   ;;  %v685_v0 = vld [vmem:[%s606_s29] sm:$0xff]  ;;  %v686_v1 = vld [vmem:[%s606_s29 + $0x8] sm:$0xff]  ;;  %s4940_s6 = sld [smem:[#allocation29_spill]]  ;;  %v747_v40 = vlaneseq }
  0xe3   : > { %v690_v2 = vsel %vm689_vm0, %v685_v0, 0.0  ;;  %v693_v3 = vsel %vm689_vm0, %v686_v1, 0.0  ;;  %v3946_v22 = vmov 0   ;;  %v2981_v31 = vld [vmem:[#allocation9] ss:$0 sm:$0xff]  ;;  %v3947_v42 = vmov 0.0  }
  0xe4   : > { %691 = vadd.xlane.f32.xlu0 %v690_v2  ;;  %832 = vmatprep.mubr.bf16.mxu1 %v3946_v22  ;;  %v2982_v35 = vld [vmem:[#allocation11] ss:$0 sm:$0xff]  ;;  %v4375_v41 = vshrl.u32 %v747_v40, 7  ;;  %v745_v44 = vld [vmem:[#allocation12] sm:$0x3]  ;;  %vm3948_vm1 = vmmov 0  }
  0xe5   : > { %3191 = vmatprep.subr.bf16.mxu0 %v3947_v42  ;;  %3193 = vmatprep.mubr.msk.bf16.mxu0 %vm3948_vm1, %v3947_v42  ;;  %s4906_s17 = smov 48   ;;  %s4904_s26 = smov 64   ;;  %vm848_vm2 = vcmask 130048   ;;  %vm1375_vm3 = vcmask 261120   ;;  %vm1378_vm4 = vcmask 392192  }
  0xe6   : > { %v4380_v43 = vsub.s32 0, %v4375_v41  ;;  %v753_v45 = vsub.s32 1, %v4375_v41  ;;  %s4900_s21 = smov 112   ;;  %s4896_s7 = smov 96  }
  0xe7   : > { %s4898_s15 = smov 32   ;;  %s4894_s0 = smov 80  }
  0xe8   : > { %694 = vadd.xlane.f32.xlu0 %v693_v3  ;;  %v3510_v14 = vld [vmem:[%s4940_s6 + $0x4] ss:$8 sps:$4 sm:$0xff]   ;;  %v3512_v15 = vld [vmem:[%s4940_s6] ss:$8 sps:$4 sm:$0xff]   ;;  %v3513_v16 = vld [vmem:[%s4940_s6 + $0x14] ss:$8 sps:$4 sm:$0xff]   ;;  %v750_v46 = vrot.slane %v745_v44, %v4380_v43  ;;  %v754_v48 = vrot.slane %v745_v44, %v753_v45 }
  0xe9   : > { %800 = vmatprep.subr.bf16.mxu1 %v3510_v14  ;;  %v3515_v17 = vld [vmem:[%s4940_s6 + $0x10] ss:$8 sps:$4 sm:$0xff]   ;;  %v3516_v18 = vld [vmem:[%s4940_s6 + $0x24] ss:$8 sps:$4 sm:$0xff]   ;;  %v3518_v19 = vld [vmem:[%s4940_s6 + $0x20] ss:$8 sps:$4 sm:$0xff]  }
  0xea   : > { %801 = vmatpush1.bf16.msra.mxu1 %v3512_v15  ;;  %v3519_v20 = vld [vmem:[%s4940_s6 + $0x34] ss:$8 sps:$4 sm:$0xff]   ;;  %v3521_v21 = vld [vmem:[%s4940_s6 + $0x30] ss:$8 sps:$4 sm:$0xff]   ;;  %s4902_s27 = smov 16   ;;  %p681_p13 = scmp.lt.s32.totalorder %s4107_s18, 1 }
  0xeb   : > { %802 = vmatprep.subr.bf16.mxu1 %v3513_v16  ;;  %s4941_s5 = sld [smem:[#allocation26_spill]]  ;;  %s4947_s19 = smov 112  }
  0xec   : > { %s682_s29 = scalar_select %p681_p13, %s4107_s18, 1 }
  0xed   : > { %s2813_s28 = sld [smem:[#allocation4 + %s4107_s18]]  ;;  %p4953_p10 = scmp.ne.s32.totalorder %s4929_s22, 0 }
  0xee   : > { %803 = vmatpush1.bf16.msra.mxu1 %v3515_v17 }
  0xef   : > { %804 = vmatprep.subr.bf16.mxu1 %v3516_v18 }
  0xf1   : > { %s683_s2 = scalar_lea.vmem %s4941_s5, %s682_s29  ;;  %s4942_s5 = sld [smem:[#allocation31_spill]] }
  0xf2   : > { %805 = vmatpush1.bf16.msra.mxu1 %v3518_v19  ;;  %s4945_s29 = smov 64  }
  0xf3   : > { %806 = vmatprep.subr.bf16.mxu1 %v3519_v20 }
  0xf6   : > { %807 = vmatpush1.bf16.msra.mxu1 %v3521_v21 }
  0xf7   : > { %3179 = vmatprep.subr.bf16.mxu1 %v3947_v42 }
 0x171   : > { %v692_v4 = vpop.xlane.xlu0 %691 }
 0x172   : > { %v697_v5 = vmul.f32 0.015625, %v692_v4 }
 0x174   : > { %v699_v6 = vsub.f32 %v685_v0, %v697_v5  ;;  %v733_v5 = vld [vmem:[%s683_s2] sm:$0x1] }
 0x175   : > { %v695_v7 = vpop.xlane.xlu0 %694 }
 0x176   : > { %v698_v8 = vmul.f32 0.015625, %v695_v7  ;;  %v701_v9 = vmul.f32 %v699_v6, %v699_v6 }
 0x178   : > { %v700_v10 = vsub.f32 %v686_v1, %v698_v8  ;;  %v703_v11 = vsel %vm689_vm0, %v701_v9, 0.0 }
 0x179   : > { %704 = vadd.xlane.f32.xlu1 %v703_v11 }
 0x17a   : > { %v702_v12 = vmul.f32 %v700_v10, %v700_v10 }
 0x17c   : > { %v706_v13 = vsel %vm689_vm0, %v702_v12, 0.0 }
 0x17d   : > { %707 = vadd.xlane.f32.xlu1 %v706_v13 }
 0x206   : > { %v705_v23 = vpop.xlane.xlu1 %704 }
 0x207   : > { %v709_v24 = vmul.f32 0.015625, %v705_v23 }
 0x209   : > { %v711_v25 = vadd.f32 1e-12, %v709_v24 }
 0x20a   : > { %v708_v26 = vpop.xlane.xlu1 %707 }
 0x20b   : > { %3566 = vrsqrt.f32 %v711_v25  ;;  %v710_v27 = vmul.f32 0.015625, %v708_v26 }
 0x20d   : > { %v712_v28 = vadd.f32 1e-12, %v710_v27 }
 0x20f   : > { %3568 = vrsqrt.f32 %v712_v28 }
 0x215   : > { %v3567_v29 = vpop.eup %3566 }
 0x216   : > { %v715_v30 = vmul.f32 %v3567_v29, %v699_v6  ;;  %v734_v6 = vsub.f32 1.0, %v733_v5 }
 0x218   : > { %v723_v34 = vmul.f32 %v2981_v31, %v715_v30  ;;  %v735_v7 = vmul.f32 -10000.0, %v734_v6 }
 0x219   : > { %v3569_v32 = vpop.eup %3568 }
 0x21a   : > { %v716_v33 = vmul.f32 %v3569_v32, %v700_v10  ;;  %v4368_v37 = vadd.f32 %v2982_v35, %v723_v34  ;;  %v4427_v8 = vrot.slane %v735_v7, %v4380_v43 }
 0x21c   : > { %v724_v36 = vmul.f32 %v2981_v31, %v716_v33 }
 0x21e   : > { %v4370_v38 = vadd.f32 %v2982_v35, %v724_v36 }
 0x220   : > { %v736_v39 = vpack.c.bf16 %v4370_v38, %v4368_v37 }
 0x222   : > { %2991 = vmatmul.mubr.msk.bf16.vlgmr.msra.gmra.mrb[0].mxu1 %vm689_vm0, %v736_v39 }
 0x223   : > { %3181 = vmatprep.mubr.msk.bf16.mxu1 %vm3948_vm1, %v3947_v42 }
 0x2f5   : > { %v834_v47 = vpop.f32.mrb[0].mxu1 }
 0x2f6   : > { %v836_v49 = vpop.f32.mrb[1].mxu1  ;;  %v835_v51 = vadd.f32 %v834_v47, %v750_v46 }
 0x2f7   : > { %v838_v50 = vpop.f32.mrb[2].mxu1  ;;  %v837_v54 = vadd.f32 %v836_v49, %v754_v48 }
 0x2f8   : > { %v839_v52 = vadd.f32 %v838_v50, %v750_v46  ;;  %v840_v53 = vpop.f32.mrb[3].mxu1 }
 0x2f9   : > { %v841_v55 = vadd.f32 %v840_v53, %v754_v48 }
 0x2fa   : > { %v843_v56 = vpack.c.bf16 %v839_v52, %v835_v51 }
 0x2fb   : > { %v4390_v57 = vpack.c.bf16 %v841_v55, %v837_v54 }
 0x2fc   : > { %975 = vrot.lane.b32.xlu1 %v843_v56, %s4906_s17  ;;  %846 = vrot.lane.b32.xlu0 %v843_v56, %s4904_s26  ;;  %s4949_s26 = smov 96  }
 0x300   : > { %973 = vrot.lane.b32.xlu1 %v843_v56, %s4900_s21  ;;  %1099 = vrot.lane.b32.xlu0 %v843_v56, %s4896_s7 }
 0x304   : > { %1101 = vrot.lane.b32.xlu1 %v843_v56, %s4898_s15  ;;  %1224 = vrot.lane.b32.xlu0 %v843_v56, %s4894_s0 }
 0x308   : > { %1226 = vrot.lane.b32.xlu1 %v843_v56, %s4902_s27 }
 0x36e   : > { %v976_v58 = vpop.permute.xlu1 %975  ;;  %v847_v59 = vpop.permute.xlu0 %846 }
 0x36f   : > { %v853_v60 = vsel %vm848_vm2, %v847_v59, 0  ;;  %v981_v61 = vsel %vm848_vm2, %v976_v58, 0 }
 0x370   : > { %3180 = vmatpush3.bf16.xpose.msra.mxu1 %v853_v60  ;;  %3192 = vmatpush3.bf16.xpose.msra.mxu0 %v981_v61 }
 0x371   : > { %3185 = vmatprep.subr.bf16.mxu1 %v3947_v42  ;;  %3203 = vmatprep.subr.bf16.mxu0 %v3947_v42 }
 0x372   : > { %v974_v62 = vpop.permute.xlu1 %973  ;;  %v1100_v2 = vpop.permute.xlu0 %1099 }
 0x376   : > { %v1102_v63 = vpop.permute.xlu1 %1101  ;;  %v1225_v4 = vpop.permute.xlu0 %1224 }
 0x377   : > { %v1107_v0 = vsel %vm848_vm2, %v1102_v63, 0  ;;  %3182 = vmatmul.mubr.msk.bf16.vlgmr.msra.gmra.mrb[4].mxu1 %vm848_vm2, %v843_v56  ;;  %3194 = vmatmul.mubr.msk.bf16.vlgmr.msra.gmra.mrb[0].mxu0 %vm848_vm2, %v974_v62 }
 0x378   : > { %3186 = vmatpush3.bf16.msra.mxu1 %v4390_v57  ;;  %3204 = vmatpush3.bf16.xpose.msra.mxu0 %v1107_v0 }
 0x379   : > { %3205 = vmatprep.mubr.msk.bf16.mxu0 %vm3948_vm1, %v3947_v42  ;;  %3215 = vmatprep.subr.bf16.mxu0 %v3947_v42 }
 0x37a   : > { %3187 = vmatprep.mubr.msk.bf16.mxu1 %vm3948_vm1, %v3947_v42  ;;  %3197 = vmatprep.subr.bf16.mxu1 %v3947_v42  ;;  %v1227_v1 = vpop.permute.xlu1 %1226 }
 0x37b   : > { %v1232_v3 = vsel %vm848_vm2, %v1227_v1, 0 }
 0x37f   : > { %3206 = vmatmul.mubr.msk.bf16.vlgmr.msra.gmra.mrb[4].mxu0 %vm848_vm2, %v1100_v2 }
 0x380   : > { %3216 = vmatpush3.bf16.xpose.msra.mxu0 %v1232_v3  ;;  %3217 = vmatprep.mubr.msk.bf16.mxu0 %vm3948_vm1, %v3947_v42 }
 0x381   : > { %3227 = vmatprep.subr.bf16.mxu0 %v3947_v42 }
 0x387   : > { %3218 = vmatmul.mubr.msk.bf16.vlgmr.msra.gmra.mrb[8].mxu0 %vm848_vm2, %v1225_v4 }
 0x388   : > { %3235 = vmatprep.mubr.msk.bf16.mxu0 %vm3948_vm1, %v3947_v42 }
 0x44a   : > { %v889_v9 = vpop.f32.mrb[4].mxu1  ;;  %v1017_v10 = vpop.f32.mrb[0].mxu0 }
 0x44b   : > { %v896_v11 = vmul.f32 0.25, %v889_v9  ;;  %v3183_v12 = vpop.f32.mrb[5].mxu1  ;;  %v3195_v13 = vpop.f32.mrb[1].mxu0  ;;  %v1024_v16 = vmul.f32 0.25, %v1017_v10 }
 0x44c   : > { %v892_v14 = vpop.f32.mrb[6].mxu1  ;;  %v1020_v15 = vpop.f32.mrb[2].mxu0 }
 0x44d   : > { %v897_v17 = vmul.f32 0.25, %v892_v14  ;;  %v3184_v18 = vpop.f32.mrb[7].mxu1  ;;  %v3196_v19 = vpop.f32.mrb[3].mxu0  ;;  %v904_v20 = vadd.f32 %v4427_v8, %v896_v11  ;;  %v1025_v24 = vmul.f32 0.25, %v1020_v15  ;;  %v4434_v26 = vadd.f32 %v1024_v16, %v4427_v8 }
 0x44f   : > { %v906_v21 = vsel %vm848_vm2, %v904_v20, -inf  ;;  %v905_v23 = vadd.f32 %v4427_v8, %v897_v17  ;;  %v1028_v33 = vsel %vm848_vm2, %v4434_v26, -inf  ;;  %v1027_v35 = vadd.f32 %v1025_v24, %v4427_v8 }
 0x450   : > { %907 = vmax.xlane.f32.xlu1 %v906_v21 }
 0x451   : > { %v909_v25 = vsel %vm848_vm2, %v905_v23, -inf  ;;  %v1031_v39 = vsel %vm848_vm2, %v1027_v35, -inf }
 0x452   : > { %910 = vmax.xlane.f32.xlu0 %v909_v25  ;;  %v1143_v27 = vpop.f32.mrb[4].mxu0 }
 0x453   : > { %v1150_v28 = vmul.f32 0.25, %v1143_v27  ;;  %v3207_v29 = vpop.f32.mrb[5].mxu0 }
 0x454   : > { %v1146_v30 = vpop.f32.mrb[6].mxu0 }
 0x455   : > { %v1151_v31 = vmul.f32 0.25, %v1146_v30  ;;  %v3208_v32 = vpop.f32.mrb[7].mxu0  ;;  %v4439_v34 = vadd.f32 %v1150_v28, %v4427_v8 }
 0x456   : > { %1029 = vmax.xlane.f32.xlu0 %v1028_v33 }
 0x457   : > { %v1154_v36 = vsel %vm848_vm2, %v4439_v34, -inf  ;;  %v1153_v40 = vadd.f32 %v1151_v31, %v4427_v8 }
 0x458   : > { %1155 = vmax.xlane.f32.xlu1 %v1154_v36 }
 0x459   : > { %v1157_v51 = vsel %vm848_vm2, %v1153_v40, -inf }
 0x45a   : > { %1032 = vmax.xlane.f32.xlu0 %v1031_v39  ;;  %v1268_v44 = vpop.f32.mrb[8].mxu0 }
 0x45b   : > { %v1275_v46 = vmul.f32 0.25, %v1268_v44  ;;  %v3219_v47 = vpop.f32.mrb[9].mxu0 }
 0x45c   : > { %v1271_v48 = vpop.f32.mrb[10].mxu0 }
 0x45d   : > { %v1276_v49 = vmul.f32 0.25, %v1271_v48  ;;  %v3220_v50 = vpop.f32.mrb[11].mxu0  ;;  %v1277_v52 = vadd.f32 %v1275_v46, %v4427_v8 }
 0x45e   : > { %1158 = vmax.xlane.f32.xlu0 %v1157_v51 }
 0x45f   : > { %v1279_v53 = vsel %vm848_vm2, %v1277_v52, -inf  ;;  %v1278_v54 = vadd.f32 %v1276_v49, %v4427_v8 }
 0x460   : > { %1280 = vmax.xlane.f32.xlu1 %v1279_v53 }
 0x461   : > { %v1282_v55 = vsel %vm848_vm2, %v1278_v54, -inf }
 0x462   : > { %1283 = vmax.xlane.f32.xlu0 %v1282_v55 }
 0x4dd   : > { %v908_v56 = vpop.xlane.xlu1 %907 }
 0x4de   : > { %v912_v58 = vsub.f32 %v904_v20, %v908_v56 }
 0x4df   : > { %v911_v59 = vpop.xlane.xlu0 %910 }
 0x4e0   : > { %v914_v60 = vmul.f32 1.442695, %v912_v58  ;;  %v913_v61 = vsub.f32 %v905_v23, %v911_v59 }
 0x4e2   : > { %3570 = vpow2.f32 %v914_v60  ;;  %v916_v62 = vmul.f32 1.442695, %v913_v61 }
 0x4e3   : > { %v1030_v63 = vpop.xlane.xlu0 %1029 }
 0x4e4   : > { %3572 = vpow2.f32 %v916_v62  ;;  %v1034_v20 = vsub.f32 %v4434_v26, %v1030_v63 }
 0x4e5   : > { %v1156_v21 = vpop.xlane.xlu1 %1155 }
 0x4e6   : > { %v1036_v23 = vmul.f32 1.442695, %v1034_v20  ;;  %v1160_v24 = vsub.f32 %v4439_v34, %v1156_v21  ;;  %v3524_v20 = vld [vmem:[%s4867_s8 + $0x10] sm:$0xff]  }
 0x4e7   : > { %v1033_v0 = vpop.xlane.xlu0 %1032 }
 0x4e8   : > { %v1035_v1 = vsub.f32 %v1027_v35, %v1033_v0  ;;  %v1162_v27 = vmul.f32 1.442695, %v1160_v24  ;;  %v3525_v24 = vld [vmem:[%s4867_s8 + $0x18] sm:$0xff]  }
 0x4ea   : > { %v1038_v2 = vmul.f32 1.442695, %v1035_v1 }
 0x4eb   : > { %v1159_v3 = vpop.xlane.xlu0 %1158 }
 0x4ec   : > { %v3571_v4 = vpop.eup %3570  ;;  %3574 = vpow2.f32 %v1038_v2  ;;  %v1161_v5 = vsub.f32 %v1153_v40, %v1159_v3 }
 0x4ed   : > { %v918_v6 = vsel %vm848_vm2, %v3571_v4, 0.0  ;;  %v1281_v25 = vpop.xlane.xlu1 %1280 }
 0x4ee   : > { %v3573_v7 = vpop.eup %3572  ;;  %v1164_v9 = vmul.f32 1.442695, %v1161_v5  ;;  %919 = vadd.xlane.f32.xlu1 %v918_v6  ;;  %v1285_v28 = vsub.f32 %v1277_v52, %v1281_v25 }
 0x4ef   : > { %v1284_v10 = vpop.xlane.xlu0 %1283  ;;  %v921_v11 = vsel %vm848_vm2, %v3573_v7, 0.0 }
 0x4f0   : > { %3576 = vpow2.f32 %v1164_v9  ;;  %v1286_v12 = vsub.f32 %v1278_v54, %v1284_v10  ;;  %922 = vadd.xlane.f32.xlu0 %v921_v11  ;;  %v1287_v29 = vmul.f32 1.442695, %v1285_v28 }
 0x4f2   : > { %v1289_v13 = vmul.f32 1.442695, %v1286_v12 }
 0x4f4   : > { %3578 = vpow2.f32 %v1289_v13  ;;  %v3522_v13 = vld [vmem:[%s4867_s8] sm:$0xff]  }
 0x4f5   : > { %3580 = vpow2.f32 %v1036_v23  ;;  %3228 = vmatpush3.bf16.msra.mxu0 %v3522_v13  ;;  %v3528_v13 = vld [vmem:[#allocation15 + $0x10] sm:$0xff]  }
 0x4f6   : > { %v3575_v14 = vpop.eup %3574  ;;  %3582 = vpow2.f32 %v1162_v27  ;;  %3229 = vmatprep.subr.bf16.mxu0 %v3947_v42 }
 0x4f7   : > { %v1043_v15 = vsel %vm848_vm2, %v3575_v14, 0.0  ;;  %3584 = vpow2.f32 %v1287_v29 }
 0x4f8   : > { %1044 = vadd.xlane.f32.xlu0 %v1043_v15 }
 0x4fa   : > { %v4454_v16 = vpop.eup %3576 }
 0x4fb   : > { %v1169_v17 = vsel %vm848_vm2, %v4454_v16, 0.0 }
 0x4fc   : > { %1170 = vadd.xlane.f32.xlu0 %v1169_v17 }
 0x4fe   : > { %v4458_v18 = vpop.eup %3578 }
 0x4ff   : > { %1052 = vrot.lane.b32.xlu1 %v4390_v57, %s4900_s21  ;;  %v1294_v19 = vsel %vm848_vm2, %v4458_v18, 0.0  ;;  %v3581_v30 = vpop.eup %3580  ;;  %s4950_s21 = smov 80  }
 0x500   : > { %1295 = vadd.xlane.f32.xlu0 %v1294_v19  ;;  %v1040_v31 = vsel %vm848_vm2, %v3581_v30, 0.0  ;;  %v3583_v32 = vpop.eup %3582 }
 0x501   : > { %v1166_v26 = vsel %vm848_vm2, %v3583_v32, 0.0  ;;  %v3585_v33 = vpop.eup %3584 }
 0x502   : > { %v1291_v34 = vsel %vm848_vm2, %v3585_v33, 0.0 }
 0x516   : > { %1177 = vrot.lane.b32.xlu0 %v4390_v57, %s4896_s7  ;;  %s4944_s7 = sld [smem:[#allocation33_spill]] }
 0x523   : > { %1041 = vadd.xlane.f32.xlu1 %v1040_v31 }
 0x527   : > { %1167 = vadd.xlane.f32.xlu1 %v1166_v26 }
 0x52b   : > { %1292 = vadd.xlane.f32.xlu1 %v1291_v34 }
 0x53c   : > { %1302 = vrot.lane.b32.xlu1 %v4390_v57, %s4894_s0  ;;  %s4948_s0 = smov 32  }
 0x57b   : > { %v920_v35 = vpop.xlane.xlu1 %919 }
 0x57c   : > { %3586 = vrcp.f32 %v920_v35 }
 0x57d   : > { %v923_v36 = vpop.xlane.xlu0 %922 }
 0x57e   : > { %3588 = vrcp.f32 %v923_v36 }
 0x57f   : > { %v1053_v48 = vpop.permute.xlu1 %1052 }
 0x585   : > { %v1045_v49 = vpop.xlane.xlu0 %1044 }
 0x586   : > { %v3587_v39 = vpop.eup %3586  ;;  %3590 = vrcp.f32 %v1045_v49 }
 0x587   : > { %v925_v44 = vmul.f32 %v3587_v39, %v3571_v4 }
 0x588   : > { %v3589_v40 = vpop.eup %3588 }
 0x589   : > { %v927_v46 = vmul.f32 %v3589_v40, %v3573_v7  ;;  %v1171_v50 = vpop.xlane.xlu0 %1170 }
 0x58b   : > { %v928_v47 = vpack.c.bf16 %v927_v46, %v925_v44 }
 0x58d   : > { %3188 = vmatmul.mubr.msk.bf16.vlgmr.msra.gmra.mrb[8].mxu1 %vm848_vm2, %v928_v47  ;;  %v1296_v53 = vpop.xlane.xlu0 %1295 }
 0x58e   : > { %3198 = vmatpush3.bf16.msra.mxu1 %v1053_v48  ;;  %3199 = vmatprep.mubr.msk.bf16.mxu1 %vm3948_vm1, %v3947_v42 }
 0x58f   : > { %3209 = vmatprep.subr.bf16.mxu1 %v3947_v42 }
 0x590   : > { %v3591_v52 = vpop.eup %3590 }
 0x591   : > { %v1049_v56 = vmul.f32 %v3591_v52, %v3575_v14  ;;  %v1178_v61 = vpop.permute.xlu0 %1177 }
 0x5b0   : > { %v1042_v57 = vpop.xlane.xlu1 %1041 }
 0x5b1   : > { %3592 = vrcp.f32 %v1042_v57 }
 0x5b4   : > { %v1168_v51 = vpop.xlane.xlu1 %1167 }
 0x5b5   : > { %3594 = vrcp.f32 %v1168_v51 }
 0x5b6   : > { %3596 = vrcp.f32 %v1171_v50 }
 0x5b8   : > { %v1293_v54 = vpop.xlane.xlu1 %1292 }
 0x5b9   : > { %3598 = vrcp.f32 %v1293_v54  ;;  %v3000_v54 = vld [vmem:[#allocation14] ss:$0 sm:$0xff] }
 0x5ba   : > { %3600 = vrcp.f32 %v1296_v53 }
 0x5bb   : > { %v3593_v55 = vpop.eup %3592 }
 0x5bc   : > { %v1047_v58 = vmul.f32 %v3593_v55, %v3581_v30  ;;  %v1303_v3 = vpop.permute.xlu1 %1302 }
 0x5be   : > { %v1050_v59 = vpack.c.bf16 %v1049_v56, %v1047_v58 }
 0x5bf   : > { %v3595_v60 = vpop.eup %3594 }
 0x5c0   : > { %3200 = vmatmul.mubr.msk.bf16.vlgmr.msra.gmra.mrb[12].mxu1 %vm848_vm2, %v1050_v59  ;;  %v3597_v62 = vpop.eup %3596  ;;  %v1173_v63 = vmul.f32 %v3595_v60, %v3583_v32 }
 0x5c1   : > { %3210 = vmatpush3.bf16.msra.mxu1 %v1178_v61  ;;  %3211 = vmatprep.mubr.msk.bf16.mxu1 %vm3948_vm1, %v3947_v42  ;;  %v1175_v0 = vmul.f32 %v3597_v62, %v4454_v16  ;;  %v3523_v16 = vld [vmem:[%s4867_s8 + $0x8] sm:$0xff]  }
 0x5c2   : > { %3221 = vmatprep.subr.bf16.mxu1 %v3947_v42  ;;  %3230 = vmatpush3.bf16.msra.mxu0 %v3523_v16 }
 0x5c3   : > { %v1176_v1 = vpack.c.bf16 %v1175_v0, %v1173_v63  ;;  %v3599_v2 = vpop.eup %3598  ;;  %3231 = vmatprep.subr.bf16.mxu0 %v3947_v42 }
 0x5c4   : > { %v3601_v4 = vpop.eup %3600  ;;  %v1298_v5 = vmul.f32 %v3599_v2, %v3585_v33 }
 0x5c5   : > { %v1300_v6 = vmul.f32 %v3601_v4, %v4458_v18 }
 0x5c6   : > { %3232 = vmatpush3.bf16.msra.mxu0 %v3524_v20 }
 0x5c7   : > { %v1301_v7 = vpack.c.bf16 %v1300_v6, %v1298_v5  ;;  %3233 = vmatprep.subr.bf16.mxu0 %v3947_v42 }
 0x5c8   : > { %3212 = vmatmul.mubr.msk.bf16.vlgmr.msra.gmra.mrb[16].mxu1 %vm848_vm2, %v1176_v1 }
 0x5c9   : > { %3222 = vmatpush3.bf16.msra.mxu1 %v1303_v3  ;;  %3223 = vmatprep.mubr.msk.bf16.mxu1 %vm3948_vm1, %v3947_v42 }
 0x5ca   : > { %3239 = vmatprep.subr.bf16.mxu1 %v3947_v42  ;;  %3234 = vmatpush3.bf16.msra.mxu0 %v3525_v24  ;;  %v3006_v24 = vld [vmem:[%s4869_s10] ss:$0 sm:$0xff] }
 0x5cb   : > { %3251 = vmatprep.subr.bf16.mxu0 %v3947_v42 }
 0x5d0   : > { %3224 = vmatmul.mubr.msk.bf16.vlgmr.msra.gmra.mrb[20].mxu1 %vm848_vm2, %v1301_v7 }
 0x5d1   : > { %3247 = vmatprep.mubr.msk.bf16.mxu1 %vm3948_vm1, %v3947_v42 }
 0x660   : > { %v966_v9 = vpop.f32.mrb[8].mxu1 }
 0x661   : > { %v3189_v10 = vpop.f32.mrb[9].mxu1 }
 0x662   : > { %v969_v11 = vpop.f32.mrb[10].mxu1 }
 0x663   : > { %v3190_v12 = vpop.f32.mrb[11].mxu1 }
 0x664   : > { %v3526_v12 = vld [vmem:[#allocation15] sm:$0xff]  }
 0x665   : > { %3240 = vmatpush3.bf16.msra.mxu1 %v3526_v12 }
 0x666   : > { %3241 = vmatprep.subr.bf16.mxu1 %v3947_v42 }
 0x693   : > { %v1092_v14 = vpop.f32.mrb[12].mxu1 }
 0x694   : > { %v3201_v15 = vpop.f32.mrb[13].mxu1 }
 0x695   : > { %v1095_v17 = vpop.f32.mrb[14].mxu1 }
 0x696   : > { %v3480_v18 = vpack.i.bf16 %v1095_v17, %v1092_v14  ;;  %v3202_v19 = vpop.f32.mrb[15].mxu1  ;;  %v3529_v14 = vld [vmem:[#allocation15 + $0x18] sm:$0xff]  }
 0x698   : > { %3481 = vrot.lane.b32.xlu1 %v3480_v18, %s4902_s27  ;;  %s4943_s27 = sld [smem:[#allocation32_spill]] }
 0x69b   : > { %v1217_v21 = vpop.f32.mrb[16].mxu1 }
 0x69c   : > { %v3213_v23 = vpop.f32.mrb[17].mxu1 }
 0x69d   : > { %v1220_v25 = vpop.f32.mrb[18].mxu1 }
 0x69e   : > { %v3485_v27 = vpack.i.bf16 %v1220_v25, %v1217_v21  ;;  %v3214_v28 = vpop.f32.mrb[19].mxu1 }
 0x6a0   : > { %3486 = vrot.lane.b32.xlu1 %v3485_v27, %s4898_s15  ;;  %s4946_s15 = smov 16  }
 0x6a3   : > { %v1342_v29 = vpop.f32.mrb[20].mxu1 }
 0x6a4   : > { %v3225_v30 = vpop.f32.mrb[21].mxu1 }
 0x6a5   : > { %v1345_v31 = vpop.f32.mrb[22].mxu1 }
 0x6a6   : > { %v3490_v32 = vpack.i.bf16 %v1345_v31, %v1342_v29  ;;  %v3226_v26 = vpop.f32.mrb[23].mxu1  ;;  %v3007_v29 = vld [vmem:[%s4870_s11] ss:$0 sm:$0xff] }
 0x6a8   : > { %3491 = vrot.lane.b32.xlu0 %v3490_v32, %s4906_s17 }
 0x70a   : > { %v3482_v33 = vpop.permute.xlu1 %3481 }
 0x70b   : > { %v3484_v35 = vunpack.i.h.bf16 %v3482_v33  ;;  %v3483_v36 = vunpack.i.l.bf16 %v3482_v33  ;;  %v3530_v33 = vld [vmem:[%s4873_s14] sm:$0xff]  }
 0x70d   : > { %v1374_v46 = vsel %vm848_vm2, %v969_v11, %v3484_v35  ;;  %v1373_v47 = vsel %vm848_vm2, %v966_v9, %v3483_v36  ;;  %v3532_v35 = vld [vmem:[%s4873_s14 + $0x10] sm:$0xff]   ;;  %v3534_v36 = vld [vmem:[%s4873_s14 + $0x20] sm:$0xff]  }
 0x712   : > { %v3487_v34 = vpop.permute.xlu1 %3486 }
 0x713   : > { %v3489_v39 = vunpack.i.h.bf16 %v3487_v34  ;;  %v3488_v40 = vunpack.i.l.bf16 %v3487_v34  ;;  %v3531_v34 = vld [vmem:[%s4873_s14 + $0x8] sm:$0xff]  }
 0x715   : > { %v1377_v57 = vsel %vm1375_vm3, %v1374_v46, %v3489_v39  ;;  %v1376_v50 = vsel %vm1375_vm3, %v1373_v47, %v3488_v40  ;;  %v3535_v39 = vld [vmem:[%s4873_s14 + $0x28] sm:$0xff]   ;;  %v3536_v40 = vld [vmem:[%s4873_s14 + $0x30] sm:$0xff]   ;;  %v3008_v46 = vld [vmem:[%s4872_s13] ss:$0 sm:$0xff] }
 0x71a   : > { %v3492_v44 = vpop.permute.xlu0 %3491 }
 0x71b   : > { %v3494_v48 = vunpack.i.h.bf16 %v3492_v44  ;;  %v3493_v49 = vunpack.i.l.bf16 %v3492_v44  ;;  %v3537_v44 = vld [vmem:[%s4873_s14 + $0x38] sm:$0xff]  }
 0x71d   : > { %v1380_v51 = vsel %vm1378_vm4, %v1377_v57, %v3494_v48  ;;  %v1379_v52 = vsel %vm1378_vm4, %v1376_v50, %v3493_v49 }
 0x71e   : > { %v1381_v53 = vpack.c.bf16 %v1380_v51, %v1379_v52 }
 0x720   : > { %3236 = vmatmul.mubr.msk.bf16.vlgmr.msra.gmra.mrb[12].mxu0 %vm689_vm0, %v1381_v53 }
 0x721   : > { %3267 = vmatprep.mubr.msk.bf16.mxu0 %vm3948_vm1, %v3947_v42  ;;  %3252 = vmatpush3.bf16.msra.mxu0 %v3530_v33  ;;  %v3546_v33 = vld [vmem:[%s4940_s6 + $0x64] ss:$8 sps:$4 sm:$0xff]  }
 0x722   : > { %3253 = vmatprep.subr.bf16.mxu0 %v3947_v42 }
 0x725   : > { %3254 = vmatpush3.bf16.msra.mxu0 %v3531_v34  ;;  %v3544_v34 = vld [vmem:[%s4940_s6 + $0x60] ss:$8 sps:$4 sm:$0xff]  }
 0x726   : > { %3255 = vmatprep.subr.bf16.mxu0 %v3947_v42 }
 0x729   : > { %3256 = vmatpush3.bf16.msra.mxu0 %v3532_v35  ;;  %v3547_v35 = vld [vmem:[%s4940_s6 + $0x70] ss:$8 sps:$4 sm:$0xff]  }
 0x72a   : > { %3257 = vmatprep.subr.bf16.mxu0 %v3947_v42 }
 0x7f3   : > { %v1458_v55 = vpop.f32.mrb[12].mxu0 }
 0x7f4   : > { %v1459_v56 = vadd.f32 %v3000_v54, %v1458_v55  ;;  %v3237_v58 = vpop.f32.mrb[13].mxu0 }
 0x7f5   : > { %v1461_v59 = vpop.f32.mrb[14].mxu0 }
 0x7f6   : > { %v1462_v60 = vadd.f32 %v3000_v54, %v1461_v59  ;;  %v3238_v61 = vpop.f32.mrb[15].mxu0  ;;  %v1465_v62 = vadd.f32 %v1459_v56, %v4368_v37 }
 0x7f8   : > { %v1469_v63 = vsel %vm689_vm0, %v1465_v62, 0.0  ;;  %v1466_v0 = vadd.f32 %v1462_v60, %v4370_v38  ;;  %v3527_v38 = vld [vmem:[#allocation15 + $0x8] sm:$0xff]  }
 0x7f9   : > { %1470 = vadd.xlane.f32.xlu1 %v1469_v63  ;;  %3242 = vmatpush3.bf16.msra.mxu1 %v3527_v38 }
 0x7fa   : > { %v1472_v1 = vsel %vm689_vm0, %v1466_v0, 0.0  ;;  %3243 = vmatprep.subr.bf16.mxu1 %v3947_v42 }
 0x7fb   : > { %1473 = vadd.xlane.f32.xlu0 %v1472_v1 }
 0x7fd   : > { %3244 = vmatpush3.bf16.msra.mxu1 %v3528_v13 }
 0x7fe   : > { %3245 = vmatprep.subr.bf16.mxu1 %v3947_v42 }
 0x801   : > { %3246 = vmatpush3.bf16.msra.mxu1 %v3529_v14 }
 0x886   : > { %v1471_v2 = vpop.xlane.xlu1 %1470 }
 0x887   : > { %v1475_v3 = vmul.f32 0.015625, %v1471_v2 }
 0x888   : > { %v1474_v4 = vpop.xlane.xlu0 %1473 }
 0x889   : > { %v1477_v5 = vsub.f32 %v1465_v62, %v1475_v3  ;;  %v1476_v6 = vmul.f32 0.015625, %v1474_v4 }
 0x88b   : > { %v1478_v7 = vsub.f32 %v1466_v0, %v1476_v6  ;;  %v1479_v9 = vmul.f32 %v1477_v5, %v1477_v5 }
 0x88d   : > { %v1481_v10 = vsel %vm689_vm0, %v1479_v9, 0.0  ;;  %v1480_v11 = vmul.f32 %v1478_v7, %v1478_v7  ;;  %v3014_v9 = vld [vmem:[%s4942_s5] ss:$0 sm:$0xff] }
 0x88e   : > { %1482 = vadd.xlane.f32.xlu0 %v1481_v10 }
 0x88f   : > { %v1484_v37 = vsel %vm689_vm0, %v1480_v11, 0.0 }
 0x892   : > { %1485 = vadd.xlane.f32.xlu0 %v1484_v37 }
 0x91b   : > { %v1483_v15 = vpop.xlane.xlu0 %1482 }
 0x91c   : > { %v1487_v16 = vmul.f32 0.015625, %v1483_v15 }
 0x91e   : > { %v1489_v17 = vadd.f32 1e-12, %v1487_v16 }
 0x91f   : > { %v1486_v18 = vpop.xlane.xlu0 %1485 }
 0x920   : > { %3602 = vrsqrt.f32 %v1489_v17  ;;  %v1488_v19 = vmul.f32 0.015625, %v1486_v18 }
 0x922   : > { %v1490_v20 = vadd.f32 1e-12, %v1488_v19 }
 0x924   : > { %3604 = vrsqrt.f32 %v1490_v20 }
 0x92a   : > { %v3603_v21 = vpop.eup %3602 }
 0x92b   : > { %v1493_v23 = vmul.f32 %v3603_v21, %v1477_v5 }
 0x92d   : > { %v1501_v27 = vmul.f32 %v3006_v24, %v1493_v23 }
 0x92e   : > { %v3605_v25 = vpop.eup %3604 }
 0x92f   : > { %v1494_v28 = vmul.f32 %v3605_v25, %v1478_v7  ;;  %v4533_v31 = vadd.f32 %v3007_v29, %v1501_v27 }
 0x931   : > { %v1502_v30 = vmul.f32 %v3006_v24, %v1494_v28 }
 0x933   : > { %v4535_v32 = vadd.f32 %v3007_v29, %v1502_v30  ;;  %v3540_v30 = vld [vmem:[%s4940_s6 + $0x44] ss:$8 sps:$4 sm:$0xff]  }
 0x934   : > { %1838 = vmatprep.subr.bf16.mxu1 %v3540_v30 }
 0x935   : > { %v1511_v26 = vpack.c.bf16 %v4535_v32, %v4533_v31 }
 0x937   : > { %3248 = vmatmul.mubr.msk.bf16.vlgmr.msra.gmra.mrb[24].mxu1 %vm689_vm0, %v1511_v26  ;;  %v3541_v26 = vld [vmem:[%s4940_s6 + $0x50] ss:$8 sps:$4 sm:$0xff]  }
 0x938   : > { %1870 = vmatprep.mubr.bf16.mxu1 %v3946_v22  ;;  %v3533_v22 = vld [vmem:[%s4873_s14 + $0x18] sm:$0xff]  }
 0x939   : > { %3258 = vmatpush3.bf16.msra.mxu0 %v3533_v22  ;;  %v3549_v22 = vld [vmem:[%s4940_s6 + $0x74] ss:$8 sps:$4 sm:$0xff]  }
 0x93a   : > { %3259 = vmatprep.subr.bf16.mxu0 %v3947_v42 }
 0x93d   : > { %3260 = vmatpush3.bf16.msra.mxu0 %v3534_v36 }
 0x93e   : > { %3261 = vmatprep.subr.bf16.mxu0 %v3947_v42 }
 0x941   : > { %3262 = vmatpush3.bf16.msra.mxu0 %v3535_v39 }
 0x942   : > { %3263 = vmatprep.subr.bf16.mxu0 %v3947_v42 }
 0x945   : > { %3264 = vmatpush3.bf16.msra.mxu0 %v3536_v40 }
 0x946   : > { %3265 = vmatprep.subr.bf16.mxu0 %v3947_v42 }
 0x949   : > { %3266 = vmatpush3.bf16.msra.mxu0 %v3537_v44 }
 0x94a   : > { %3283 = vmatprep.subr.bf16.mxu0 %v3947_v42 }
 0xa0a   : > { %v1588_v47 = vpop.f32.mrb[24].mxu1 }
 0xa0b   : > { %v1589_v48 = vadd.f32 %v3008_v46, %v1588_v47  ;;  %v3249_v49 = vpop.f32.mrb[25].mxu1 }
 0xa0c   : > { %v1591_v57 = vpop.f32.mrb[26].mxu1  ;;  %v3023_v49 = vld [vmem:[%s4943_s27] ss:$0 sm:$0xff] }
 0xa0d   : > { %v1597_v50 = vmul.f32 0.044715, %v1589_v48  ;;  %v1592_v51 = vadd.f32 %v3008_v46, %v1591_v57  ;;  %v3250_v52 = vpop.f32.mrb[27].mxu1  ;;  %v1595_v2 = vmul.f32 0.5, %v1589_v48 }
 0xa0f   : > { %v1599_v53 = vmul.f32 %v1597_v50, %v1589_v48  ;;  %v1598_v54 = vmul.f32 0.044715, %v1592_v51  ;;  %v1596_v3 = vmul.f32 0.5, %v1592_v51 }
 0xa11   : > { %v1601_v55 = vmul.f32 %v1599_v53, %v1589_v48  ;;  %v1600_v56 = vmul.f32 %v1598_v54, %v1592_v51  ;;  %v3024_v53 = vld [vmem:[%s4944_s7] ss:$0 sm:$0xff] }
 0xa13   : > { %v1603_v58 = vadd.f32 %v1601_v55, %v1589_v48  ;;  %v1602_v59 = vmul.f32 %v1600_v56, %v1592_v51 }
 0xa15   : > { %v1605_v60 = vmul.f32 0.7978846, %v1603_v58  ;;  %v1604_v61 = vadd.f32 %v1602_v59, %v1592_v51  ;;  %v1783_v59 = vld [vmem:[#allocation12 + $0x2] sm:$0x3] }
 0xa17   : > { %3606 = vtanh.f32 %v1605_v60  ;;  %v1606_v62 = vmul.f32 0.7978846, %v1604_v61  ;;  %v1788_v60 = vrot.slane %v1783_v59, %v4380_v43 }
 0xa19   : > { %3608 = vtanh.f32 %v1606_v62  ;;  %v1792_v62 = vrot.slane %v1783_v59, %v753_v45 }
 0xa21   : > { %v3607_v63 = vpop.eup %3606 }
 0xa22   : > { %v1609_v0 = vadd.f32 1.0, %v3607_v63 }
 0xa23   : > { %v3609_v1 = vpop.eup %3608 }
 0xa24   : > { %v1610_v4 = vadd.f32 1.0, %v3609_v1  ;;  %v1611_v5 = vmul.f32 %v1609_v0, %v1595_v2 }
 0xa26   : > { %v1612_v6 = vmul.f32 %v1610_v4, %v1596_v3 }
 0xa28   : > { %v1613_v7 = vpack.c.bf16 %v1612_v6, %v1611_v5 }
 0xa2a   : > { %3268 = vmatmul.mubr.bf16.vlgmr.msra.gmra.mrb[16].mxu0 %v1613_v7 }
 0xa2b   : > { %3285 = vmatprep.mubr.msk.bf16.mxu0 %vm3948_vm1, %v3947_v42 }
 0xafd   : > { %v1719_v10 = vpop.f32.mrb[16].mxu0 }
 0xafe   : > { %v1720_v11 = vadd.f32 %v3014_v9, %v1719_v10  ;;  %v3269_v37 = vpop.f32.mrb[17].mxu0 }
 0xaff   : > { %v1722_v12 = vpop.f32.mrb[18].mxu0 }
 0xb00   : > { %v1723_v38 = vadd.f32 %v3014_v9, %v1722_v12  ;;  %v3270_v13 = vpop.f32.mrb[19].mxu0  ;;  %v1726_v14 = vadd.f32 %v1720_v11, %v4533_v31  ;;  %v3538_v31 = vld [vmem:[%s4940_s6 + $0x40] ss:$8 sps:$4 sm:$0xff]  }
 0xb01   : > { %1839 = vmatpush1.bf16.msra.mxu1 %v3538_v31 }
 0xb02   : > { %v1730_v15 = vsel %vm689_vm0, %v1726_v14, 0.0  ;;  %v1727_v16 = vadd.f32 %v1723_v38, %v4535_v32  ;;  %v3543_v32 = vld [vmem:[%s4940_s6 + $0x54] ss:$8 sps:$4 sm:$0xff]  }
 0xb03   : > { %1731 = vadd.xlane.f32.xlu1 %v1730_v15  ;;  %1840 = vmatprep.subr.bf16.mxu1 %v3543_v32 }
 0xb04   : > { %v1733_v17 = vsel %vm689_vm0, %v1727_v16, 0.0 }
 0xb05   : > { %1734 = vadd.xlane.f32.xlu0 %v1733_v17  ;;  %1841 = vmatpush1.bf16.msra.mxu1 %v3541_v26 }
 0xb06   : > { %1842 = vmatprep.subr.bf16.mxu1 %v3546_v33 }
 0xb09   : > { %1843 = vmatpush1.bf16.msra.mxu1 %v3544_v34 }
 0xb0a   : > { %1844 = vmatprep.subr.bf16.mxu1 %v3549_v22 }
 0xb0d   : > { %1845 = vmatpush1.bf16.msra.mxu1 %v3547_v35 }
 0xb0e   : > { %3271 = vmatprep.subr.bf16.mxu1 %v3947_v42 }
 0xb90   : > { %v1732_v18 = vpop.xlane.xlu1 %1731 }
 0xb91   : > { %v1736_v19 = vmul.f32 0.015625, %v1732_v18 }
 0xb92   : > { %v1735_v20 = vpop.xlane.xlu0 %1734 }
 0xb93   : > { %v1738_v21 = vsub.f32 %v1726_v14, %v1736_v19  ;;  %v1737_v23 = vmul.f32 0.015625, %v1735_v20 }
 0xb95   : > { %v1739_v24 = vsub.f32 %v1727_v16, %v1737_v23  ;;  %v1740_v25 = vmul.f32 %v1738_v21, %v1738_v21 }
 0xb97   : > { %v1742_v27 = vsel %vm689_vm0, %v1740_v25, 0.0  ;;  %v1741_v28 = vmul.f32 %v1739_v24, %v1739_v24 }
 0xb98   : > { %1743 = vadd.xlane.f32.xlu1 %v1742_v27 }
 0xb99   : > { %v1745_v29 = vsel %vm689_vm0, %v1741_v28, 0.0 }
 0xb9a   : > { %1746 = vadd.xlane.f32.xlu0 %v1745_v29 }
 0xc25   : > { %v1744_v36 = vpop.xlane.xlu1 %1743 }
 0xc26   : > { %v1748_v39 = vmul.f32 0.015625, %v1744_v36 }
 0xc27   : > { %v1747_v40 = vpop.xlane.xlu0 %1746 }
 0xc28   : > { %v1750_v44 = vadd.f32 1e-12, %v1748_v39  ;;  %v1749_v46 = vmul.f32 0.015625, %v1747_v40 }
 0xc2a   : > { %3610 = vrsqrt.f32 %v1750_v44  ;;  %v1751_v47 = vadd.f32 1e-12, %v1749_v46 }
 0xc2c   : > { %3612 = vrsqrt.f32 %v1751_v47 }
 0xc34   : > { %v3611_v48 = vpop.eup %3610 }
 0xc35   : > { %v1754_v57 = vmul.f32 %v3611_v48, %v1738_v21 }
 0xc36   : > { %v3613_v50 = vpop.eup %3612 }
 0xc37   : > { %v1762_v51 = vmul.f32 %v3023_v49, %v1754_v57  ;;  %v1755_v52 = vmul.f32 %v3613_v50, %v1739_v24 }
 0xc39   : > { %v1763_v54 = vmul.f32 %v3023_v49, %v1755_v52  ;;  %v4618_v55 = vadd.f32 %v3024_v53, %v1762_v51 }
 0xc3b   : > { %v4620_v56 = vadd.f32 %v3024_v53, %v1763_v54 }
 0xc3d   : > { %v1772_v58 = vpack.c.bf16 %v4620_v56, %v4618_v55 }
 0xc3f   : > { %3041 = vmatmul.mubr.msk.bf16.vlgmr.msra.gmra.mrb[28].mxu1 %vm689_vm0, %v1772_v58 }
 0xc40   : > { %3273 = vmatprep.mubr.msk.bf16.mxu1 %vm3948_vm1, %v3947_v42 }
 0xd12   : > { %v1872_v61 = vpop.f32.mrb[28].mxu1 }
 0xd13   : > { %v1874_v63 = vpop.f32.mrb[29].mxu1  ;;  %v1873_v1 = vadd.f32 %v1872_v61, %v1788_v60 }
 0xd14   : > { %v1876_v0 = vpop.f32.mrb[30].mxu1  ;;  %v1875_v4 = vadd.f32 %v1874_v63, %v1792_v62 }
 0xd15   : > { %v1877_v2 = vadd.f32 %v1876_v0, %v1788_v60  ;;  %v1878_v3 = vpop.f32.mrb[31].mxu1 }
 0xd16   : > { %v1879_v5 = vadd.f32 %v1878_v3, %v1792_v62 }
 0xd17   : > { %v1881_v6 = vpack.c.bf16 %v1877_v2, %v1873_v1 }
 0xd18   : > { %v4630_v7 = vpack.c.bf16 %v1879_v5, %v1875_v4 }
 0xd19   : > { %2006 = vrot.lane.b32.xlu0 %v1881_v6, %s4906_s17  ;;  %1884 = vrot.lane.b32.xlu1 %v1881_v6, %s4945_s29  ;;  %s4951_s17 = smov 48  }
 0xd1d   : > { %2257 = vrot.lane.b32.xlu0 %v1881_v6, %s4946_s15  ;;  %2004 = vrot.lane.b32.xlu1 %v1881_v6, %s4947_s19 }
 0xd21   : > { %2132 = vrot.lane.b32.xlu1 %v1881_v6, %s4948_s0 }
 0xd25   : > { %2130 = vrot.lane.b32.xlu1 %v1881_v6, %s4949_s26 }
 0xd29   : > { %2255 = vrot.lane.b32.xlu1 %v1881_v6, %s4950_s21 }
 0xd8b   : > { %v2007_v41 = vpop.permute.xlu0 %2006  ;;  %v1885_v43 = vpop.permute.xlu1 %1884 }
 0xd8c   : > { %v2012_v45 = vsel %vm848_vm2, %v2007_v41, 0  ;;  %v1890_v9 = vsel %vm848_vm2, %v1885_v43, 0 }
 0xd8d   : > { %3272 = vmatpush3.bf16.xpose.msra.mxu1 %v1890_v9  ;;  %3284 = vmatpush3.bf16.xpose.msra.mxu0 %v2012_v45 }
 0xd8e   : > { %3277 = vmatprep.subr.bf16.mxu1 %v3947_v42  ;;  %3295 = vmatprep.subr.bf16.mxu0 %v3947_v42 }
 0xd8f   : > { %v2005_v10 = vpop.permute.xlu1 %2004  ;;  %v2258_v12 = vpop.permute.xlu0 %2257 }
 0xd90   : > { %v2263_v13 = vsel %vm848_vm2, %v2258_v12, 0 }
 0xd93   : > { %v2133_v11 = vpop.permute.xlu1 %2132 }
 0xd94   : > { %v2138_v37 = vsel %vm848_vm2, %v2133_v11, 0  ;;  %3274 = vmatmul.mubr.msk.bf16.vlgmr.msra.gmra.mrb[32].mxu1 %vm848_vm2, %v1881_v6  ;;  %3286 = vmatmul.mubr.msk.bf16.vlgmr.msra.gmra.mrb[20].mxu0 %vm848_vm2, %v2005_v10 }
 0xd95   : > { %3278 = vmatpush3.bf16.msra.mxu1 %v4630_v7  ;;  %3296 = vmatpush3.bf16.xpose.msra.mxu0 %v2138_v37 }
 0xd96   : > { %3297 = vmatprep.mubr.msk.bf16.mxu0 %vm3948_vm1, %v3947_v42  ;;  %3307 = vmatprep.subr.bf16.mxu0 %v3947_v42 }
 0xd97   : > { %3279 = vmatprep.mubr.msk.bf16.mxu1 %vm3948_vm1, %v3947_v42  ;;  %3289 = vmatprep.subr.bf16.mxu1 %v3947_v42  ;;  %v2131_v38 = vpop.permute.xlu1 %2130 }
 0xd9b   : > { %v2256_v14 = vpop.permute.xlu1 %2255 }
 0xd9c   : > { %3298 = vmatmul.mubr.msk.bf16.vlgmr.msra.gmra.mrb[24].mxu0 %vm848_vm2, %v2131_v38 }
 0xd9d   : > { %3308 = vmatpush3.bf16.xpose.msra.mxu0 %v2263_v13  ;;  %3309 = vmatprep.mubr.msk.bf16.mxu0 %vm3948_vm1, %v3947_v42 }
 0xd9e   : > { %3319 = vmatprep.subr.bf16.mxu0 %v3947_v42 }
 0xda4   : > { %3310 = vmatmul.mubr.msk.bf16.vlgmr.msra.gmra.mrb[28].mxu0 %vm848_vm2, %v2256_v14 }
 0xda5   : > { %3327 = vmatprep.mubr.msk.bf16.mxu0 %vm3948_vm1, %v3947_v42 }
 0xe67   : > { %v1926_v15 = vpop.f32.mrb[32].mxu1  ;;  %v2048_v16 = vpop.f32.mrb[20].mxu0 }
 0xe68   : > { %v1933_v17 = vmul.f32 0.25, %v1926_v15  ;;  %v2055_v18 = vmul.f32 0.25, %v2048_v16  ;;  %v3275_v19 = vpop.f32.mrb[33].mxu1  ;;  %v3287_v20 = vpop.f32.mrb[21].mxu0 }
 0xe69   : > { %v1929_v21 = vpop.f32.mrb[34].mxu1  ;;  %v2051_v23 = vpop.f32.mrb[22].mxu0 }
 0xe6a   : > { %v1934_v24 = vmul.f32 0.25, %v1929_v21  ;;  %v3276_v25 = vpop.f32.mrb[35].mxu1  ;;  %v3288_v27 = vpop.f32.mrb[23].mxu0  ;;  %v1935_v28 = vadd.f32 %v1933_v17, %v4427_v8  ;;  %v2056_v29 = vmul.f32 0.25, %v2051_v23  ;;  %v2057_v32 = vadd.f32 %v2055_v18, %v4427_v8 }
 0xe6c   : > { %v1937_v30 = vsel %vm848_vm2, %v1935_v28, -inf  ;;  %v1936_v31 = vadd.f32 %v1934_v24, %v4427_v8  ;;  %v2059_v22 = vsel %vm848_vm2, %v2057_v32, -inf  ;;  %v2058_v36 = vadd.f32 %v2056_v29, %v4427_v8 }
 0xe6d   : > { %1938 = vmax.xlane.f32.xlu0 %v1937_v30 }
 0xe6e   : > { %v1940_v26 = vsel %vm848_vm2, %v1936_v31, -inf  ;;  %v2062_v46 = vsel %vm848_vm2, %v2058_v36, -inf }
 0xe6f   : > { %1941 = vmax.xlane.f32.xlu1 %v1940_v26  ;;  %v2174_v33 = vpop.f32.mrb[24].mxu0 }
 0xe70   : > { %v2181_v34 = vmul.f32 0.25, %v2174_v33  ;;  %v3299_v35 = vpop.f32.mrb[25].mxu0 }
 0xe71   : > { %2060 = vmax.xlane.f32.xlu0 %v2059_v22  ;;  %v2177_v39 = vpop.f32.mrb[26].mxu0 }
 0xe72   : > { %v2182_v40 = vmul.f32 0.25, %v2177_v39  ;;  %v3300_v44 = vpop.f32.mrb[27].mxu0  ;;  %v2183_v48 = vadd.f32 %v2181_v34, %v4427_v8 }
 0xe74   : > { %v2184_v47 = vadd.f32 %v2182_v40, %v4427_v8  ;;  %v2185_v52 = vsel %vm848_vm2, %v2183_v48, -inf }
 0xe75   : > { %2063 = vmax.xlane.f32.xlu0 %v2062_v46 }
 0xe76   : > { %v2188_v49 = vsel %vm848_vm2, %v2184_v47, -inf }
 0xe77   : > { %2189 = vmax.xlane.f32.xlu1 %v2188_v49  ;;  %v2299_v57 = vpop.f32.mrb[28].mxu0 }
 0xe78   : > { %v2306_v50 = vmul.f32 0.25, %v2299_v57  ;;  %v3311_v51 = vpop.f32.mrb[29].mxu0 }
 0xe79   : > { %2186 = vmax.xlane.f32.xlu0 %v2185_v52  ;;  %v2302_v53 = vpop.f32.mrb[30].mxu0 }
 0xe7a   : > { %v2307_v54 = vmul.f32 0.25, %v2302_v53  ;;  %v3312_v58 = vpop.f32.mrb[31].mxu0  ;;  %v2308_v59 = vadd.f32 %v2306_v50, %v4427_v8 }
 0xe7c   : > { %v2310_v60 = vsel %vm848_vm2, %v2308_v59, -inf  ;;  %v2309_v61 = vadd.f32 %v2307_v54, %v4427_v8 }
 0xe7d   : > { %2311 = vmax.xlane.f32.xlu0 %v2310_v60 }
 0xe7e   : > { %v2313_v62 = vsel %vm848_vm2, %v2309_v61, -inf }
 0xe7f   : > { %2314 = vmax.xlane.f32.xlu1 %v2313_v62 }
 0xefa   : > { %v1939_v63 = vpop.xlane.xlu0 %1938 }
 0xefb   : > { %v1943_v0 = vsub.f32 %v1935_v28, %v1939_v63 }
 0xefc   : > { %v1942_v1 = vpop.xlane.xlu1 %1941 }
 0xefd   : > { %v1945_v2 = vmul.f32 1.442695, %v1943_v0  ;;  %v1944_v3 = vsub.f32 %v1936_v31, %v1942_v1 }
 0xefe   : > { %v2061_v4 = vpop.xlane.xlu0 %2060 }
 0xeff   : > { %3614 = vpow2.f32 %v1945_v2  ;;  %v1947_v5 = vmul.f32 1.442695, %v1944_v3  ;;  %v2065_v6 = vsub.f32 %v2057_v32, %v2061_v4 }
 0xf01   : > { %3616 = vpow2.f32 %v1947_v5  ;;  %v2067_v41 = vmul.f32 1.442695, %v2065_v6 }
 0xf02   : > { %v2064_v43 = vpop.xlane.xlu0 %2063 }
 0xf03   : > { %3618 = vpow2.f32 %v2067_v41  ;;  %v2066_v45 = vsub.f32 %v2058_v36, %v2064_v43 }
 0xf04   : > { %v2190_v9 = vpop.xlane.xlu1 %2189 }
 0xf05   : > { %v2069_v8 = vmul.f32 1.442695, %v2066_v45  ;;  %v2192_v10 = vsub.f32 %v2184_v47, %v2190_v9 }
 0xf06   : > { %v2187_v11 = vpop.xlane.xlu0 %2186 }
 0xf07   : > { %3620 = vpow2.f32 %v2069_v8  ;;  %v2195_v37 = vmul.f32 1.442695, %v2192_v10  ;;  %v2191_v12 = vsub.f32 %v2183_v48, %v2187_v11 }
 0xf09   : > { %v3615_v38 = vpop.eup %3614  ;;  %3622 = vpow2.f32 %v2195_v37  ;;  %v2193_v13 = vmul.f32 1.442695, %v2191_v12 }
 0xf0a   : > { %v2312_v14 = vpop.xlane.xlu0 %2311  ;;  %v1949_v15 = vsel %vm848_vm2, %v3615_v38, 0.0 }
 0xf0b   : > { %v3617_v16 = vpop.eup %3616  ;;  %3624 = vpow2.f32 %v2193_v13  ;;  %v2316_v17 = vsub.f32 %v2308_v59, %v2312_v14  ;;  %1950 = vadd.xlane.f32.xlu0 %v1949_v15  ;;  %v3551_v15 = vld [vmem:[%s4867_s8 + $0x28] sm:$0xff]  }
 0xf0c   : > { %v1952_v18 = vsel %vm848_vm2, %v3617_v16, 0.0  ;;  %v2315_v32 = vpop.xlane.xlu1 %2314 }
 0xf0d   : > { %v3619_v19 = vpop.eup %3618  ;;  %v2318_v20 = vmul.f32 1.442695, %v2316_v17  ;;  %1953 = vadd.xlane.f32.xlu1 %v1952_v18  ;;  %v2317_v26 = vsub.f32 %v2309_v61, %v2315_v32  ;;  %v3552_v17 = vld [vmem:[%s4867_s8 + $0x30] sm:$0xff]  }
 0xf0e   : > { %v2071_v21 = vsel %vm848_vm2, %v3619_v19, 0.0 }
 0xf0f   : > { %3626 = vpow2.f32 %v2318_v20  ;;  %2072 = vadd.xlane.f32.xlu0 %v2071_v21  ;;  %v2320_v33 = vmul.f32 1.442695, %v2317_v26 }
 0xf11   : > { %v3621_v23 = vpop.eup %3620  ;;  %3628 = vpow2.f32 %v2320_v33 }
 0xf12   : > { %v2074_v24 = vsel %vm848_vm2, %v3621_v23, 0.0 }
 0xf13   : > { %v3623_v25 = vpop.eup %3622  ;;  %2075 = vadd.xlane.f32.xlu1 %v2074_v24 }
 0xf14   : > { %v2200_v29 = vsel %vm848_vm2, %v3623_v25, 0.0 }
 0xf15   : > { %v3625_v27 = vpop.eup %3624 }
 0xf16   : > { %v2197_v28 = vsel %vm848_vm2, %v3625_v27, 0.0 }
 0xf17   : > { %2198 = vadd.xlane.f32.xlu0 %v2197_v28  ;;  %2201 = vadd.xlane.f32.xlu1 %v2200_v29 }
 0xf19   : > { %v3627_v30 = vpop.eup %3626 }
 0xf1a   : > { %v2322_v31 = vsel %vm848_vm2, %v3627_v30, 0.0 }
 0xf1b   : > { %2323 = vadd.xlane.f32.xlu0 %v2322_v31  ;;  %v3629_v34 = vpop.eup %3628 }
 0xf1c   : > { %v2325_v35 = vsel %vm848_vm2, %v3629_v34, 0.0 }
 0xf28   : > { %2208 = vrot.lane.b32.xlu1 %v4630_v7, %s4949_s26 }
 0xf31   : > { %2083 = vrot.lane.b32.xlu0 %v4630_v7, %s4947_s19  ;;  %s2815_s19 = scalar_lea.vmem [#allocation2], %s2813_s28 }
 0xf4c   : > { %2326 = vadd.xlane.f32.xlu1 %v2325_v35 }
 0xf5d   : > { %2333 = vrot.lane.b32.xlu1 %v4630_v7, %s4950_s21  ;;  %s2814_s21 = sld [smem:[#allocation5 + %s4107_s18]] }
 0xf98   : > { %v1951_v22 = vpop.xlane.xlu0 %1950 }
 0xf99   : > { %3630 = vrcp.f32 %v1951_v22 }
 0xf9a   : > { %v1954_v36 = vpop.xlane.xlu1 %1953 }
 0xf9b   : > { %3632 = vrcp.f32 %v1954_v36 }
 0xf9c   : > { %v2073_v39 = vpop.xlane.xlu0 %2072 }
 0xf9d   : > { %3634 = vrcp.f32 %v2073_v39 }
 0xfa0   : > { %v2076_v40 = vpop.xlane.xlu1 %2075 }
 0xfa1   : > { %3636 = vrcp.f32 %v2076_v40 }
 0xfa3   : > { %v3631_v44 = vpop.eup %3630 }
 0xfa4   : > { %v2199_v46 = vpop.xlane.xlu0 %2198  ;;  %v2202_v47 = vpop.xlane.xlu1 %2201  ;;  %v1956_v49 = vmul.f32 %v3631_v44, %v3615_v38  ;;  %v3550_v38 = vld [vmem:[%s4867_s8 + $0x20] sm:$0xff]  }
 0xfa5   : > { %v3633_v48 = vpop.eup %3632  ;;  %3638 = vrcp.f32 %v2199_v46  ;;  %3320 = vmatpush3.bf16.msra.mxu0 %v3550_v38 }
 0xfa6   : > { %v1958_v57 = vmul.f32 %v3633_v48, %v3617_v16  ;;  %3640 = vrcp.f32 %v2202_v47  ;;  %3321 = vmatprep.subr.bf16.mxu0 %v3947_v42 }
 0xfa7   : > { %v3635_v52 = vpop.eup %3634 }
 0xfa8   : > { %v2324_v50 = vpop.xlane.xlu0 %2323  ;;  %v1959_v51 = vpack.c.bf16 %v1958_v57, %v1956_v49  ;;  %v2078_v58 = vmul.f32 %v3635_v52, %v3619_v19  ;;  %v2209_v62 = vpop.permute.xlu1 %2208  ;;  %v3058_v57 = vld [vmem:[#allocation14 + $0x1] ss:$0 sm:$0xff] }
 0xfa9   : > { %3642 = vrcp.f32 %v2324_v50  ;;  %3322 = vmatpush3.bf16.msra.mxu0 %v3551_v15 }
 0xfaa   : > { %3280 = vmatmul.mubr.msk.bf16.vlgmr.msra.gmra.mrb[36].mxu1 %vm848_vm2, %v1959_v51  ;;  %3323 = vmatprep.subr.bf16.mxu0 %v3947_v42 }
 0xfab   : > { %v3637_v7 = vpop.eup %3636  ;;  %3291 = vmatprep.mubr.msk.bf16.mxu1 %vm3948_vm1, %v3947_v42 }
 0xfac   : > { %v2080_v53 = vmul.f32 %v3637_v7, %v3621_v23  ;;  %v2084_v54 = vpop.permute.xlu0 %2083  ;;  %v3553_v23 = vld [vmem:[%s4867_s8 + $0x38] sm:$0xff]  }
 0xfad   : > { %3290 = vmatpush3.bf16.msra.mxu1 %v2084_v54  ;;  %3324 = vmatpush3.bf16.msra.mxu0 %v3552_v17 }
 0xfae   : > { %3301 = vmatprep.subr.bf16.mxu1 %v3947_v42  ;;  %v2081_v60 = vpack.c.bf16 %v2080_v53, %v2078_v58  ;;  %3325 = vmatprep.subr.bf16.mxu0 %v3947_v42 }
 0xfaf   : > { %v3639_v59 = vpop.eup %3638 }
 0xfb0   : > { %v3641_v61 = vpop.eup %3640  ;;  %v2204_v63 = vmul.f32 %v3639_v59, %v3625_v27 }
 0xfb1   : > { %v2206_v0 = vmul.f32 %v3641_v61, %v3623_v25  ;;  %3326 = vmatpush3.bf16.msra.mxu0 %v3553_v23 }
 0xfb2   : > { %3292 = vmatmul.mubr.msk.bf16.vlgmr.msra.gmra.mrb[40].mxu1 %vm848_vm2, %v2081_v60  ;;  %3343 = vmatprep.subr.bf16.mxu0 %v3947_v42 }
 0xfb3   : > { %3302 = vmatpush3.bf16.msra.mxu1 %v2209_v62  ;;  %3303 = vmatprep.mubr.msk.bf16.mxu1 %vm3948_vm1, %v3947_v42  ;;  %v2207_v1 = vpack.c.bf16 %v2206_v0, %v2204_v63  ;;  %v3643_v4 = vpop.eup %3642 }
 0xfb4   : > { %3313 = vmatprep.subr.bf16.mxu1 %v3947_v42  ;;  %v2329_v6 = vmul.f32 %v3643_v4, %v3627_v30 }
 0xfba   : > { %3304 = vmatmul.mubr.msk.bf16.vlgmr.msra.gmra.mrb[44].mxu1 %vm848_vm2, %v2207_v1 }
 0xfbb   : > { %3315 = vmatprep.mubr.msk.bf16.mxu1 %vm3948_vm1, %v3947_v42 }
 0xfd9   : > { %v2327_v2 = vpop.xlane.xlu1 %2326 }
 0xfda   : > { %3644 = vrcp.f32 %v2327_v2 }
 0xfdd   : > { %v2334_v3 = vpop.permute.xlu1 %2333 }
 0xfde   : > { %3314 = vmatpush3.bf16.msra.mxu1 %v2334_v3 }
 0xfdf   : > { %3331 = vmatprep.subr.bf16.mxu1 %v3947_v42 }
 0xfe4   : > { %v3645_v5 = vpop.eup %3644 }
 0xfe5   : > { %v2331_v41 = vmul.f32 %v3645_v5, %v3629_v34 }
 0xfe7   : > { %v2332_v43 = vpack.c.bf16 %v2331_v41, %v2329_v6  ;;  %v3554_v41 = vld [vmem:[#allocation15 + $0x20] sm:$0xff]  }
 0xfe9   : > { %3316 = vmatmul.mubr.msk.bf16.vlgmr.msra.gmra.mrb[48].mxu1 %vm848_vm2, %v2332_v43  ;;  %v3556_v43 = vld [vmem:[#allocation15 + $0x30] sm:$0xff]  }
 0xfea   : > { %3339 = vmatprep.mubr.msk.bf16.mxu1 %vm3948_vm1, %v3947_v42  ;;  %3332 = vmatpush3.bf16.msra.mxu1 %v3554_v41 }
 0xfeb   : > { %3333 = vmatprep.subr.bf16.mxu1 %v3947_v42 }
0x107d   : > { %v1997_v45 = vpop.f32.mrb[36].mxu1 }
0x107e   : > { %v3281_v9 = vpop.f32.mrb[37].mxu1 }
0x107f   : > { %v2000_v8 = vpop.f32.mrb[38].mxu1 }
0x1080   : > { %v3282_v10 = vpop.f32.mrb[39].mxu1 }
0x1085   : > { %v2123_v11 = vpop.f32.mrb[40].mxu1 }
0x1086   : > { %v3293_v37 = vpop.f32.mrb[41].mxu1 }
0x1087   : > { %v2126_v12 = vpop.f32.mrb[42].mxu1 }
0x1088   : > { %v3495_v13 = vpack.i.bf16 %v2126_v12, %v2123_v11  ;;  %v3294_v14 = vpop.f32.mrb[43].mxu1 }
0x1089   : > { %v3066_v14 = vld [vmem:[%s4869_s10 + $0x1] ss:$0 sm:$0xff] }
0x108a   : > { %3496 = vrot.lane.b32.xlu1 %v3495_v13, %s4946_s15  ;;  %s2817_s15 = scalar_lea.vmem [#allocation2], %s2814_s21  ;;  %s3956_s21 = smov [#allocation17]  }
0x108d   : > { %v2248_v16 = vpop.f32.mrb[44].mxu1 }
0x108e   : > { %v3305_v18 = vpop.f32.mrb[45].mxu1 }
0x108f   : > { %v2251_v19 = vpop.f32.mrb[46].mxu1  ;;  %v3067_v18 = vld [vmem:[%s4870_s11 + $0x1] ss:$0 sm:$0xff] }
0x1090   : > { %v3500_v20 = vpack.i.bf16 %v2251_v19, %v2248_v16  ;;  %v3306_v21 = vpop.f32.mrb[47].mxu1 }
0x1092   : > { %3501 = vrot.lane.b32.xlu0 %v3500_v20, %s4948_s0  ;;  %s680_s0 = scalar_lea.vmem [#allocation17], %s4319_s16 }
0x1093   : > { %s2838_s2 = sshll.u32 %s680_s0, 4  ;;  %s4817_s2 = int_to_ptr.vmem [resolvable:$true] %s2838_s2 }
0x10bc   : > { %v2373_v24 = vpop.f32.mrb[48].mxu1 }
0x10bd   : > { %v3317_v25 = vpop.f32.mrb[49].mxu1 }
0x10be   : > { %v2376_v27 = vpop.f32.mrb[50].mxu1  ;;  %v3559_v25 = vld [vmem:[%s4873_s14 + $0x48] sm:$0xff]  }
0x10bf   : > { %v3505_v28 = vpack.i.bf16 %v2376_v27, %v2373_v24  ;;  %v3318_v29 = vpop.f32.mrb[51].mxu1  ;;  %v3558_v24 = vld [vmem:[%s4873_s14 + $0x40] sm:$0xff]   ;;  %v3560_v27 = vld [vmem:[%s4873_s14 + $0x50] sm:$0xff]  }
0x10c0   : > { %v3562_v29 = vld [vmem:[%s4873_s14 + $0x60] sm:$0xff]  }
0x10c1   : > { %3506 = vrot.lane.b32.xlu1 %v3505_v28, %s4951_s17  ;;  %v3561_v28 = vld [vmem:[%s4873_s14 + $0x58] sm:$0xff]   ;;  %s3105_s17 = sshll.u32 %s4107_s18, 4  ;;  %s3848_s18 = scalar_lea.vmem %s4817_s2, 16 }
0x10c2   : > { %p3849_p2 = scmp.ne.s32.totalorder %s4817_s2, %s3848_s18 }
0x10c4   : > { %p3850_p7 = pnand %p3849_p2, %p4953_p10 }
0x10c6   : > { %p3851_p5 = pneg %p3850_p7 }
0x10fc   : > { %v3497_v30 = vpop.permute.xlu1 %3496 }
0x10fd   : > { %v3499_v32 = vunpack.i.h.bf16 %v3497_v30  ;;  %v3498_v26 = vunpack.i.l.bf16 %v3497_v30  ;;  %v3563_v30 = vld [vmem:[%s4873_s14 + $0x68] sm:$0xff]  }
0x10ff   : > { %v2405_v22 = vsel %vm848_vm2, %v2000_v8, %v3499_v32  ;;  %v2404_v36 = vsel %vm848_vm2, %v1997_v45, %v3498_v26  ;;  %v3557_v45 = vld [vmem:[#allocation15 + $0x38] sm:$0xff]   ;;  %v3069_v26 = vld [vmem:[%s4872_s13 + $0x1] ss:$0 sm:$0xff] }
0x1100   : > { %v3565_v32 = vld [vmem:[%s4873_s14 + $0x78] sm:$0xff]  }
0x1104   : > { %v3502_v31 = vpop.permute.xlu0 %3501 }
0x1105   : > { %v3504_v33 = vunpack.i.h.bf16 %v3502_v31  ;;  %v3503_v34 = vunpack.i.l.bf16 %v3502_v31  ;;  %v3564_v31 = vld [vmem:[%s4873_s14 + $0x70] sm:$0xff]  }
0x1107   : > { %v2406_v44 = vsel %vm1375_vm3, %v2404_v36, %v3503_v34  ;;  %v2407_v46 = vsel %vm1375_vm3, %v2405_v22, %v3504_v33 }
0x1133   : > { %v3507_v35 = vpop.permute.xlu1 %3506 }
0x1134   : > { %v3509_v39 = vunpack.i.h.bf16 %v3507_v35  ;;  %v3508_v40 = vunpack.i.l.bf16 %v3507_v35 }
0x1136   : > { %v2408_v47 = vsel %vm1378_vm4, %v2406_v44, %v3508_v40  ;;  %v2409_v48 = vsel %vm1378_vm4, %v2407_v46, %v3509_v39 }
0x1137   : > { %v2410_v49 = vpack.c.bf16 %v2409_v48, %v2408_v47 }
0x1139   : > { %3328 = vmatmul.mubr.msk.bf16.vlgmr.msra.gmra.mrb[32].mxu0 %vm689_vm0, %v2410_v49 }
0x113a   : > { %3359 = vmatprep.mubr.msk.bf16.mxu0 %vm3948_vm1, %v3947_v42  ;;  %3344 = vmatpush3.bf16.msra.mxu0 %v3558_v24 }
0x113b   : > { %3345 = vmatprep.subr.bf16.mxu0 %v3947_v42 }
0x113e   : > { %3346 = vmatpush3.bf16.msra.mxu0 %v3559_v25  ;;  %v3104_v25 = vld [vmem:[%s4944_s7 + $0x1] ss:$0 sm:$0xff] }
0x113f   : > { %3347 = vmatprep.subr.bf16.mxu0 %v3947_v42 }
0x1142   : > { %3348 = vmatpush3.bf16.msra.mxu0 %v3560_v27 }
0x1143   : > { %3349 = vmatprep.subr.bf16.mxu0 %v3947_v42 }
0x1146   : > { %3350 = vmatpush3.bf16.msra.mxu0 %v3561_v28 }
0x1147   : > { %3351 = vmatprep.subr.bf16.mxu0 %v3947_v42 }
0x114a   : > { %3352 = vmatpush3.bf16.msra.mxu0 %v3562_v29 }
0x114b   : > { %3353 = vmatprep.subr.bf16.mxu0 %v3947_v42 }
0x114e   : > { %3354 = vmatpush3.bf16.msra.mxu0 %v3563_v30 }
0x114f   : > { %3355 = vmatprep.subr.bf16.mxu0 %v3947_v42 }
0x1152   : > { %3356 = vmatpush3.bf16.msra.mxu0 %v3564_v31 }
0x1153   : > { %3357 = vmatprep.subr.bf16.mxu0 %v3947_v42 }
0x1156   : > { %3358 = vmatpush3.bf16.msra.mxu0 %v3565_v32 }
0x120c   : > { %v2489_v50 = vpop.f32.mrb[32].mxu0 }
0x120d   : > { %v2490_v51 = vadd.f32 %v3058_v57, %v2489_v50  ;;  %v3329_v52 = vpop.f32.mrb[33].mxu0 }
0x120e   : > { %v2492_v7 = vpop.f32.mrb[34].mxu0 }
0x120f   : > { %v2493_v53 = vadd.f32 %v3058_v57, %v2492_v7  ;;  %v3330_v54 = vpop.f32.mrb[35].mxu0  ;;  %v2496_v58 = vadd.f32 %v2490_v51, %v4618_v55 }
0x1211   : > { %v2502_v59 = vsel %vm689_vm0, %v2496_v58, 0.0  ;;  %v2497_v60 = vadd.f32 %v2493_v53, %v4620_v56  ;;  %v3555_v56 = vld [vmem:[#allocation15 + $0x28] sm:$0xff]  }
0x1212   : > { %2503 = vadd.xlane.f32.xlu0 %v2502_v59  ;;  %3334 = vmatpush3.bf16.msra.mxu1 %v3555_v56 }
0x1213   : > { %v2505_v61 = vsel %vm689_vm0, %v2497_v60, 0.0  ;;  %3335 = vmatprep.subr.bf16.mxu1 %v3947_v42 }
0x1214   : > { %2506 = vadd.xlane.f32.xlu1 %v2505_v61 }
0x1216   : > { %3336 = vmatpush3.bf16.msra.mxu1 %v3556_v43 }
0x1217   : > { %3337 = vmatprep.subr.bf16.mxu1 %v3947_v42 }
0x121a   : > { %3338 = vmatpush3.bf16.msra.mxu1 %v3557_v45 }
0x129f   : > { %v2504_v62 = vpop.xlane.xlu0 %2503 }
0x12a0   : > { %v2508_v63 = vmul.f32 0.015625, %v2504_v62 }
0x12a1   : > { %v2507_v0 = vpop.xlane.xlu1 %2506 }
0x12a2   : > { %v2510_v1 = vsub.f32 %v2496_v58, %v2508_v63  ;;  %v2509_v2 = vmul.f32 0.015625, %v2507_v0  ;;  %v3092_v63 = vld [vmem:[%s4942_s5 + $0x1] ss:$0 sm:$0xff]  ;;  %s4952_s5 = sld [smem:[#allocation34_spill]] }
0x12a4   : > { %v2511_v3 = vsub.f32 %v2497_v60, %v2509_v2  ;;  %v2512_v4 = vmul.f32 %v2510_v1, %v2510_v1 }
0x12a6   : > { %v2514_v5 = vsel %vm689_vm0, %v2512_v4, 0.0  ;;  %v2513_v6 = vmul.f32 %v2511_v3, %v2511_v3 }
0x12a7   : > { %2515 = vadd.xlane.f32.xlu0 %v2514_v5 }
0x12a8   : > { %v2517_v55 = vsel %vm689_vm0, %v2513_v6, 0.0  ;;  %s4815_s6 = scalar_lea.hbm %s4952_s5, %s3105_s17 }
0x12ab   : > { %2518 = vadd.xlane.f32.xlu0 %v2517_v55 }
0x1334   : > { %v2516_v9 = vpop.xlane.xlu0 %2515 }
0x1335   : > { %v2520_v8 = vmul.f32 0.015625, %v2516_v9 }
0x1337   : > { %v2522_v10 = vadd.f32 1e-12, %v2520_v8 }
0x1338   : > { %v2519_v11 = vpop.xlane.xlu0 %2518 }
0x1339   : > { %3646 = vrsqrt.f32 %v2522_v10  ;;  %v2521_v37 = vmul.f32 0.015625, %v2519_v11 }
0x133b   : > { %v2523_v12 = vadd.f32 1e-12, %v2521_v37 }
0x133d   : > { %3648 = vrsqrt.f32 %v2523_v12 }
0x1343   : > { %v3647_v38 = vpop.eup %3646 }
0x1344   : > { %v2526_v13 = vmul.f32 %v3647_v38, %v2510_v1 }
0x1346   : > { %v2534_v16 = vmul.f32 %v3066_v14, %v2526_v13 }
0x1347   : > { %v3649_v15 = vpop.eup %3648 }
0x1348   : > { %v2527_v17 = vmul.f32 %v3649_v15, %v2511_v3  ;;  %v4749_v20 = vadd.f32 %v3067_v18, %v2534_v16 }
0x134a   : > { %v2535_v19 = vmul.f32 %v3066_v14, %v2527_v17 }
0x134c   : > { %v4751_v21 = vadd.f32 %v3067_v18, %v2535_v19 }
0x134e   : > { %v2544_v23 = vpack.c.bf16 %v4751_v21, %v4749_v20 }
0x1350   : > { %3340 = vmatmul.mubr.msk.bf16.vlgmr.msra.gmra.mrb[52].mxu1 %vm689_vm0, %v2544_v23 }
0x1423   : > { %v2623_v33 = vpop.f32.mrb[52].mxu1 }
0x1424   : > { %v2624_v34 = vadd.f32 %v3069_v26, %v2623_v33  ;;  %v3341_v35 = vpop.f32.mrb[53].mxu1 }
0x1425   : > { %v2626_v22 = vpop.f32.mrb[54].mxu1 }
0x1426   : > { %v2632_v36 = vmul.f32 0.044715, %v2624_v34  ;;  %v2627_v39 = vadd.f32 %v3069_v26, %v2626_v22  ;;  %v3342_v40 = vpop.f32.mrb[55].mxu1  ;;  %v2630_v54 = vmul.f32 0.5, %v2624_v34 }
0x1428   : > { %v2634_v44 = vmul.f32 %v2632_v36, %v2624_v34  ;;  %v2633_v46 = vmul.f32 0.044715, %v2627_v39  ;;  %v2631_v58 = vmul.f32 0.5, %v2627_v39 }
0x142a   : > { %v2636_v47 = vmul.f32 %v2634_v44, %v2624_v34  ;;  %v2635_v48 = vmul.f32 %v2633_v46, %v2627_v39 }
0x142c   : > { %v2638_v49 = vadd.f32 %v2636_v47, %v2624_v34  ;;  %v2637_v57 = vmul.f32 %v2635_v48, %v2627_v39 }
0x142e   : > { %v2640_v50 = vmul.f32 0.7978846, %v2638_v49  ;;  %v2639_v42 = vadd.f32 %v2637_v57, %v2627_v39 }
0x1430   : > { %3650 = vtanh.f32 %v2640_v50  ;;  %v2641_v51 = vmul.f32 0.7978846, %v2639_v42 }
0x1432   : > { %3652 = vtanh.f32 %v2641_v51 }
0x143a   : > { %v3651_v52 = vpop.eup %3650 }
0x143b   : > { %v2644_v7 = vadd.f32 1.0, %v3651_v52 }
0x143c   : > { %v3653_v53 = vpop.eup %3652 }
0x143d   : > { %v2645_v59 = vadd.f32 1.0, %v3653_v53  ;;  %v2646_v60 = vmul.f32 %v2644_v7, %v2630_v54 }
0x143f   : > { %v2647_v61 = vmul.f32 %v2645_v59, %v2631_v58 }
0x1441   : > { %v2648_v62 = vpack.c.bf16 %v2647_v61, %v2646_v60 }
0x1443   : > { %3360 = vmatmul.mubr.bf16.vlgmr.msra.gmra.mrb[36].mxu0 %v2648_v62 }
0x1516   : > { %v2756_v0 = vpop.f32.mrb[36].mxu0 }
0x1517   : > { %v2757_v1 = vadd.f32 %v3092_v63, %v2756_v0  ;;  %v3361_v2 = vpop.f32.mrb[37].mxu0 }
0x1518   : > { %v2759_v3 = vpop.f32.mrb[38].mxu0 }
0x1519   : > { %v2760_v4 = vadd.f32 %v3092_v63, %v2759_v3  ;;  %v3362_v5 = vpop.f32.mrb[39].mxu0  ;;  %v2763_v6 = vadd.f32 %v2757_v1, %v4749_v20 }
0x151b   : > { %v2769_v55 = vsel %vm689_vm0, %v2763_v6, 0.0  ;;  %v2764_v41 = vadd.f32 %v2760_v4, %v4751_v21  ;;  %v3103_v21 = vld [vmem:[%s4943_s27 + $0x1] ss:$0 sm:$0xff] }
0x151c   : > { %2770 = vadd.xlane.f32.xlu0 %v2769_v55 }
0x151d   : > { %v2772_v56 = vsel %vm689_vm0, %v2764_v41, 0.0 }
0x151e   : > { %2773 = vadd.xlane.f32.xlu1 %v2772_v56 }
0x15a9   : > { %v2771_v43 = vpop.xlane.xlu0 %2770 }
0x15aa   : > { %v2775_v45 = vmul.f32 0.015625, %v2771_v43 }
0x15ab   : > { %v2774_v9 = vpop.xlane.xlu1 %2773 }
0x15ac   : > { %v2777_v8 = vsub.f32 %v2763_v6, %v2775_v45  ;;  %v2776_v10 = vmul.f32 0.015625, %v2774_v9 }
0x15ae   : > { %v2778_v11 = vsub.f32 %v2764_v41, %v2776_v10  ;;  %v2779_v37 = vmul.f32 %v2777_v8, %v2777_v8 }
0x15b0   : > { %v2781_v12 = vsel %vm689_vm0, %v2779_v37, 0.0  ;;  %v2780_v38 = vmul.f32 %v2778_v11, %v2778_v11 }
0x15b1   : > { %2782 = vadd.xlane.f32.xlu0 %v2781_v12 }
0x15b2   : > { %v2784_v13 = vsel %vm689_vm0, %v2780_v38, 0.0 }
0x15b3   : > { %2785 = vadd.xlane.f32.xlu1 %v2784_v13 }
0x163e   : > { %v2783_v14 = vpop.xlane.xlu0 %2782 }
0x163f   : > { %v2787_v15 = vmul.f32 0.015625, %v2783_v14 }
0x1640   : > { %v2786_v16 = vpop.xlane.xlu1 %2785 }
0x1641   : > { %v2789_v17 = vadd.f32 1e-12, %v2787_v15  ;;  %v2788_v18 = vmul.f32 0.015625, %v2786_v16 }
0x1643   : > { %3654 = vrsqrt.f32 %v2789_v17  ;;  %v2790_v19 = vadd.f32 1e-12, %v2788_v18 }
0x1645   : > { %3656 = vrsqrt.f32 %v2790_v19 }
0x164d   : > { %v3655_v20 = vpop.eup %3654 }
0x164e   : > { %v2793_v23 = vmul.f32 %v3655_v20, %v2777_v8 }
0x164f   : > { %v3657_v24 = vpop.eup %3656 }
0x1650   : > { %v2801_v27 = vmul.f32 %v3103_v21, %v2793_v23  ;;  %v2794_v28 = vmul.f32 %v3657_v24, %v2778_v11 }
0x1652   : > { %v2809_v29 = vadd.f32 %v3104_v25, %v2801_v27  ;;  %v2802_v30 = vmul.f32 %v3103_v21, %v2794_v28 }
0x1654   : > { %2811 = vst.msk [vmem:[#allocation2] sm:$0xff] %vm689_vm0, %v2809_v29  ;;  %v2810_v31 = vadd.f32 %v3104_v25, %v2802_v30 }
0x1656   : > { %2812 = vst.msk [vmem:[#allocation2 + $0x8] sm:$0xff] %vm689_vm0, %v2810_v31 }
0x165d   : > { %v2818_v32 = vld [vmem:[%s2817_s15] sm:$0x1]  ;;  %s3852_s15 = sshll.u32 %s3956_s21, 4  ;;  %s3853_s15 = int_to_ptr.vmem [resolvable:$false] %s3852_s15 }
0x165e   : > { %2820 = vrot.lane.b32.xlu0 %v2818_v32, %s4945_s29  ;;  %v2816_v33 = vld [vmem:[%s2815_s19] sm:$0x1]  ;;  %s2826_s29 = scalar_lea.sflag [#allocation8], %s4319_s16  ;;  %s3854_s1 = scalar_lea.vmem %s3853_s15, 32 }
0x165f   : > { %p3855_p6 = scmp.lt.s32.totalorder %s4817_s2, %s3853_s15  ;;  %p3856_p8 = scmp.lt.s32.totalorder %s3854_s1, %s3848_s18 }
0x1661   : > { %p3857_p0 = por %p3856_p8, %p3855_p6 }
0x1663   : > { %p3858_p12 = pnand %p3857_p0, %p3851_p5 }
0x16d0   : > { %v2821_v26 = vpop.permute.xlu0 %2820 }
0x16d1   : > { %v2823_v34 = vsel %vm689_vm0, %v2816_v33, %v2821_v26 }
0x16d2   : > { %2824 = vst [vmem:[%s680_s0] sm:$0x1] %v2823_v34 }
0x16d3   : > { %3861 = shalt.err (!%p3858_p12)
}
0x16d4   : > { %s3862_s16 = scalar_lea.hbm %s4815_s6, 16  ;;  %s3866_s0 = scalar_lea.hbm %s4952_s5, 32 }
0x16d5   : > { %p3863_p3 = scmp.ne.s32.totalorder %s4815_s6, %s3862_s16  ;;  %p3867_p11 = scmp.lt.u32.totalorder %s4815_s6, %s4952_s5 }
0x16d6   : > { %p3868_p1 = scmp.lt.u32.totalorder %s3866_s0, %s3862_s16  ;;  %p3870_p2 = scmp.lt.u32.totalorder %s3862_s16, %s4815_s6 }
0x16d7   : > { %p3864_p4 = pnand %p3863_p3, %p4953_p10 }
0x16d8   : > { %p3869_p13 = por %p3868_p1, %p3867_p11 }
0x16d9   : > { %p3865_p9 = pneg %p3864_p4 }
0x16da   : > { %p3871_p7 = por %p3870_p2, %p3869_p13 }
0x16dc   : > { %p3872_p5 = pnand %p3871_p7, %p3865_p9 }
0x16de   : > { %3875 = shalt.err (!%p3872_p5)
}
0x16df   : > { %3385 = dma.vmem_to_hbm [thread:$0]  (%p4953_p10), %s4817_s2, 16, %s4815_s6, %s2826_s29  }
0x16e0 PF: > { %s2850_s18 = sand.u32 1, %s3916_s23   ;;  %p4954_p6 = scmp.ne.s32.totalorder %s4930_s4, 0 }
0x16e1   : > { %p4955_p8 = scmp.ge.s32.totalorder %s3928_s25, 2  ;;  %s2851_s21 = scalar_lea.sflag [#allocation8], %s2850_s18 }
0x16e3   : > { %p3408_p0 = pnand %p4955_p8, %p4954_p6 }
0x16e5   : > { %3911 = dma.done.wait (!%p3408_p0), %s2851_s21, 16  }
0x16e6   : > { %3913 = vsyncadd (!%p3408_p0), %s2851_s21, 4294967280  ;;  %p42_p12 = scmp.ge.s32.totalorder %s4246_s20, 4   ;;  %s4956_s23 = smov %s3920_s24 }
0x16e7   : > { %s4957_s24 = smov %s3924_s3  ;;  %s4958_s3 = smov %s4258_s30 }
0x16e8   : > { %s4959_s25 = smov %s4246_s20  ;;  %44 = sbr.rel (!%p42_p12) target bundleno = 35 (0x23), region = 174 }
0x16ef   :  { %2855 = vsyncpa [#allocation7], 1 }
0x16f0   :  { %2857 = vsyncpa [#allocation7 + $0x1], 1 }
0x16f1   :  { %2858 = vsyncpa [#allocation10], 1 }
0x16f2   :  { %2859 = vsyncpa [#allocation13], 1 }
0x16f3   :  { %2860 = vsyncpa [#allocation16], 1 }
0x16f4   :  { %2861 = vsyncpa [#allocation8], 1 }
0x16f5   :  { %2863 = vsyncpa [#allocation8 + $0x1], 1 }

</bundles_post_ra>
